<compile_context>
chip_gen: v7x
topology: tpu7x:2x2x1
jax: 0.10.0
libtpu: 0.0.40
codegen_flags: <defaults>
</compile_context>

<pallas_src>
import math
import functools

import jax
import jax.numpy as jnp
from jax.experimental import pallas as pl
from jax.experimental.pallas import tpu as pltpu


def encoder_layer_kernel(x_ref, mask_ref,
                         ln1_g_ref, ln1_b_ref,
                         wq_ref, bq_ref, wk_ref, bk_ref, wv_ref, bv_ref,
                         wo_ref, bo_ref,
                         ln2_g_ref, ln2_b_ref,
                         w1_ref, b1_ref, w2_ref, b2_ref,
                         out_ref, *attw_refs, nhead):
    x = x_ref[0].astype(jnp.float32)     # (S, E)
    mask = mask_ref[0]                   # (1, S) additive float bias (finite)
    S, E = x.shape
    cdt = wq_ref.dtype                   # matmul operand dtype (bf16 or f32)

    def layer_norm(v, g, b):
        mu = jnp.mean(v, axis=-1, keepdims=True)
        var = jnp.mean(jnp.square(v - mu), axis=-1, keepdims=True)
        return (v - mu) * jax.lax.rsqrt(var + 1e-6) * g + b

    # ---- self-attention block (pre-norm) ----
    y = layer_norm(x, ln1_g_ref[...], ln1_b_ref[...])                 # f32 (S, E)
    yb = jnp.broadcast_to(y.astype(cdt)[None], (nhead, S, E))         # (H, S, E)

    # per-head projections, heads as a leading batch dim (scale folded into wq/bq)
    q = jnp.einsum('hse,hed->hsd', yb, wq_ref[...],
                   preferred_element_type=jnp.float32) + bq_ref[...]  # (H, S, Dh)
    k = jnp.einsum('hse,hed->hsd', yb, wk_ref[...],
                   preferred_element_type=jnp.float32) + bk_ref[...]
    v = jnp.einsum('hse,hed->hsd', yb, wv_ref[...],
                   preferred_element_type=jnp.float32) + bv_ref[...]

    s = jnp.einsum('hqd,hkd->hqk', q.astype(cdt), k.astype(cdt),
                   preferred_element_type=jnp.float32)                # (H, S, S)
    s = s + mask[None]                                                # add mask once
    m = jnp.max(s, axis=-1, keepdims=True)
    p = jnp.exp(s - m)                                                # unnormalized probs
    inv = pl.reciprocal(jnp.sum(p, axis=-1, keepdims=True), approx=True)  # (H, S, 1)

    # normalize on the small (H, S, Dh) context instead of the (H, S, S) probs
    o = jnp.einsum('hqk,hkd->hqd', p.astype(cdt), v.astype(cdt),
                   preferred_element_type=jnp.float32) * inv          # (H, S, Dh)

    # output projection split per head (avoids head concat / transpose in-kernel)
    proj = jnp.einsum('hsd,hde->hse', o.astype(cdt), wo_ref[...],
                      preferred_element_type=jnp.float32)             # (H, S, E)
    attn = jnp.sum(proj, axis=0) + bo_ref[...]                        # (S, E)
    # self_attention_dropout: identity (eval mode)
    x = x + attn

    # ---- feed-forward block (pre-norm) ----
    y = layer_norm(x, ln2_g_ref[...], ln2_b_ref[...])
    h1 = jnp.maximum(
        jnp.dot(y.astype(cdt), w1_ref[...],
                preferred_element_type=jnp.float32) + b1_ref[...], 0.0)
    # ffn internal dropout: identity (eval mode)
    y2 = jnp.dot(h1.astype(cdt), w2_ref[...],
                 preferred_element_type=jnp.float32) + b2_ref[...]
    # ffn_dropout: identity (eval mode)
    x = x + y2

    out_ref[0] = x.astype(out_ref.dtype)
    if attw_refs:
        # PyTorch default: attention weights averaged over heads (only computed
        # when this output is actually requested).
        w = p * inv
        attw_refs[0][0] = (jnp.sum(w, axis=0) * (1.0 / nhead)).astype(
            attw_refs[0].dtype)


def encoder_layer(x_sbe, padding_mask, params, nhead, *,
                  return_attn_weights=True, use_bf16=True):
    """x_sbe: (S, B, E) f32 (PyTorch seq-first). padding_mask: (B, S) bool."""
    S, B, E = x_sbe.shape
    F_ = params["w1"].shape[0]
    Dh = E // nhead
    scale = 1.0 / math.sqrt(Dh)
    mm_dtype = jnp.bfloat16 if use_bf16 else jnp.float32

    x = jnp.transpose(x_sbe, (1, 0, 2)).astype(jnp.float32)            # (B, S, E)
    # finite large-negative mask (avoids NaN on fully-masked rows)
    mask_add = jnp.where(padding_mask, -1e30, 0.0).astype(jnp.float32)
    mask_add = mask_add.reshape(B, 1, S)

    # ---- host-side weight prep: per-head split, pre-transposed, scale folded ----
    w_in = params["w_in"]            # (3E, E)
    b_in = params["b_in"]            # (3E,)

    def per_head_in(w_rows, b_rows, s=1.0):
        # y @ w_rows.T per head -> (nhead, E, Dh) weight, (nhead, 1, Dh) bias
        w_h = jnp.transpose(w_rows.reshape(nhead, Dh, E), (0, 2, 1)) * s
        b_h = b_rows.reshape(nhead, 1, Dh) * s
        return w_h.astype(mm_dtype), b_h.astype(jnp.float32)

    wq_h, bq_h = per_head_in(w_in[0:E],         b_in[0:E],         scale)
    wk_h, bk_h = per_head_in(w_in[E:2 * E],     b_in[E:2 * E])
    wv_h, bv_h = per_head_in(w_in[2 * E:3 * E], b_in[2 * E:3 * E])

    w_out = params["w_out"]                                           # (E, E)
    wo_h = jnp.transpose(w_out, (1, 0)).reshape(nhead, Dh, E).astype(mm_dtype)
    bo = params["b_out"].reshape(1, E).astype(jnp.float32)

    ln1_g = params["ln1_g"].reshape(1, E).astype(jnp.float32)
    ln1_b = params["ln1_b"].reshape(1, E).astype(jnp.float32)
    ln2_g = params["ln2_g"].reshape(1, E).astype(jnp.float32)
    ln2_b = params["ln2_b"].reshape(1, E).astype(jnp.float32)

    w1t = jnp.transpose(params["w1"]).astype(mm_dtype)                # (E, F)
    b1 = params["b1"].reshape(1, F_).astype(jnp.float32)
    w2t = jnp.transpose(params["w2"]).astype(mm_dtype)                # (F, E)
    b2 = params["b2"].reshape(1, E).astype(jnp.float32)

    def full_spec(shape):
        return pl.BlockSpec(shape, lambda b: (0,) * len(shape))

    kernel = functools.partial(encoder_layer_kernel, nhead=nhead)

    out_shapes = [jax.ShapeDtypeStruct((B, S, E), jnp.float32)]
    out_specs = [pl.BlockSpec((1, S, E), lambda b: (b, 0, 0))]
    if return_attn_weights:
        out_shapes.append(jax.ShapeDtypeStruct((B, S, S), jnp.float32))
        out_specs.append(pl.BlockSpec((1, S, S), lambda b: (b, 0, 0)))

    inputs = (x, mask_add,
              ln1_g, ln1_b,
              wq_h, bq_h, wk_h, bk_h, wv_h, bv_h,
              wo_h, bo,
              ln2_g, ln2_b,
              w1t, b1, w2t, b2)

    results = pl.pallas_call(
        kernel,
        out_shape=tuple(out_shapes),
        grid_spec=pltpu.PrefetchScalarGridSpec(
            num_scalar_prefetch=0,
            grid=(B,),                       # parallel over batch (both TCs on v7x)
            in_specs=[
                pl.BlockSpec((1, S, E), lambda b: (b, 0, 0)),   # x
                pl.BlockSpec((1, 1, S), lambda b: (b, 0, 0)),   # additive mask
                full_spec(ln1_g.shape), full_spec(ln1_b.shape),
                full_spec(wq_h.shape), full_spec(bq_h.shape),
                full_spec(wk_h.shape), full_spec(bk_h.shape),
                full_spec(wv_h.shape), full_spec(bv_h.shape),
                full_spec(wo_h.shape), full_spec(bo.shape),
                full_spec(ln2_g.shape), full_spec(ln2_b.shape),
                full_spec(w1t.shape), full_spec(b1.shape),
                full_spec(w2t.shape), full_spec(b2.shape),
            ],
            out_specs=out_specs,
        ),
        compiler_params=pltpu.CompilerParams(
            dimension_semantics=("parallel",),
            vmem_limit_bytes=32 * 1024 * 1024),
    )(*inputs)

    out = jnp.transpose(results[0], (1, 0, 2))   # back to (S, B, E)
    attw = results[1] if return_attn_weights else None
    return out, attw
    # TODO(synk): for large S, switch the attention block to a flash-style
    # online softmax tiled over key blocks (and drop the (B,S,S) weights output).


def xavier_uniform(key, shape, gain=1.0):
    fan_out, fan_in = shape
    a = gain * math.sqrt(6.0 / (fan_in + fan_out))
    return jax.random.uniform(key, shape, jnp.float32, -a, a)


def init_params(key, hidden, filt):
    ks = jax.random.split(key, 8)
    return {
        "ln1_g": jnp.ones((hidden,), jnp.float32),
        "ln1_b": jnp.zeros((hidden,), jnp.float32),
        "w_in": xavier_uniform(ks[0], (3 * hidden, hidden)),
        "b_in": jnp.zeros((3 * hidden,), jnp.float32),
        "w_out": xavier_uniform(ks[1], (hidden, hidden)),
        "b_out": jnp.zeros((hidden,), jnp.float32),
        "ln2_g": jnp.ones((hidden,), jnp.float32),
        "ln2_b": jnp.zeros((hidden,), jnp.float32),
        "w1": xavier_uniform(ks[2], (filt, hidden)),
        "b1": jnp.zeros((filt,), jnp.float32),
        "w2": xavier_uniform(ks[3], (hidden, filt)),
        "b2": jnp.zeros((hidden,), jnp.float32),
    }


if __name__ == "__main__":
    hidden, filt, nhead = 32, 64, 4
    S, B = 8, 2

    key = jax.random.PRNGKey(0)
    kx, kp = jax.random.split(key)
    x = jax.random.normal(kx, (S, B, hidden), jnp.float32)   # seq-first, like PyTorch
    # pad the last two positions of batch element 1
    padding_mask = jnp.zeros((B, S), jnp.bool_).at[1, S - 2:].set(True)

    params = init_params(kp, hidden, filt)

    out, att_w = encoder_layer(x, padding_mask, params, nhead)
    jax.block_until_ready((out, att_w))

    assert out.shape == (S, B, hidden)
    assert att_w.shape == (B, S, S)
    assert bool(jnp.all(jnp.isfinite(out)))
    assert bool(jnp.all(jnp.isfinite(att_w)))
    print("KERNEL_OK")
</pallas_src>

<mosaic_0001>
module attributes {stable_mosaic.version = 11 : i64} {
  func.func @encoder_layer_kernel(%arg0: i32, %arg1: memref<1x8x32xf32, #tpu.memory_space<vmem>>, %arg2: memref<1x1x8xf32, #tpu.memory_space<vmem>>, %arg3: memref<1x32xf32, #tpu.memory_space<vmem>>, %arg4: memref<1x32xf32, #tpu.memory_space<vmem>>, %arg5: memref<4x32x8xbf16, #tpu.memory_space<vmem>>, %arg6: memref<4x1x8xf32, #tpu.memory_space<vmem>>, %arg7: memref<4x32x8xbf16, #tpu.memory_space<vmem>>, %arg8: memref<4x1x8xf32, #tpu.memory_space<vmem>>, %arg9: memref<4x32x8xbf16, #tpu.memory_space<vmem>>, %arg10: memref<4x1x8xf32, #tpu.memory_space<vmem>>, %arg11: memref<4x8x32xbf16, #tpu.memory_space<vmem>>, %arg12: memref<1x32xf32, #tpu.memory_space<vmem>>, %arg13: memref<1x32xf32, #tpu.memory_space<vmem>>, %arg14: memref<1x32xf32, #tpu.memory_space<vmem>>, %arg15: memref<32x64xbf16, #tpu.memory_space<vmem>>, %arg16: memref<1x64xf32, #tpu.memory_space<vmem>>, %arg17: memref<64x32xbf16, #tpu.memory_space<vmem>>, %arg18: memref<1x32xf32, #tpu.memory_space<vmem>>, %arg19: memref<1x8x32xf32, #tpu.memory_space<vmem>>, %arg20: memref<1x8x8xf32, #tpu.memory_space<vmem>>) attributes {dimension_semantics = [#tpu.dimension_semantics<parallel>], iteration_bounds = array<i64: 2>, scalar_prefetch = 0 : i64, scratch_operands = 0 : i64, tpu.core_type = #tpu.core_type<tc>, window_params = [{transform_indices = @transform_0, window_bounds = array<i64: 1, 8, 32>}, {transform_indices = @transform_1, window_bounds = array<i64: 1, 1, 8>}, {pipeline_mode = #tpu.pipeline_mode<synchronous>, transform_indices = @transform_2, window_bounds = array<i64: 1, 32>}, {pipeline_mode = #tpu.pipeline_mode<synchronous>, transform_indices = @transform_3, window_bounds = array<i64: 1, 32>}, {pipeline_mode = #tpu.pipeline_mode<synchronous>, transform_indices = @transform_4, window_bounds = array<i64: 4, 32, 8>}, {pipeline_mode = #tpu.pipeline_mode<synchronous>, transform_indices = @transform_5, window_bounds = array<i64: 4, 1, 8>}, {pipeline_mode = #tpu.pipeline_mode<synchronous>, transform_indices = @transform_6, window_bounds = array<i64: 4, 32, 8>}, {pipeline_mode = #tpu.pipeline_mode<synchronous>, transform_indices = @transform_7, window_bounds = array<i64: 4, 1, 8>}, {pipeline_mode = #tpu.pipeline_mode<synchronous>, transform_indices = @transform_8, window_bounds = array<i64: 4, 32, 8>}, {pipeline_mode = #tpu.pipeline_mode<synchronous>, transform_indices = @transform_9, window_bounds = array<i64: 4, 1, 8>}, {pipeline_mode = #tpu.pipeline_mode<synchronous>, transform_indices = @transform_10, window_bounds = array<i64: 4, 8, 32>}, {pipeline_mode = #tpu.pipeline_mode<synchronous>, transform_indices = @transform_11, window_bounds = array<i64: 1, 32>}, {pipeline_mode = #tpu.pipeline_mode<synchronous>, transform_indices = @transform_12, window_bounds = array<i64: 1, 32>}, {pipeline_mode = #tpu.pipeline_mode<synchronous>, transform_indices = @transform_13, window_bounds = array<i64: 1, 32>}, {pipeline_mode = #tpu.pipeline_mode<synchronous>, transform_indices = @transform_14, window_bounds = array<i64: 32, 64>}, {pipeline_mode = #tpu.pipeline_mode<synchronous>, transform_indices = @transform_15, window_bounds = array<i64: 1, 64>}, {pipeline_mode = #tpu.pipeline_mode<synchronous>, transform_indices = @transform_16, window_bounds = array<i64: 64, 32>}, {pipeline_mode = #tpu.pipeline_mode<synchronous>, transform_indices = @transform_17, window_bounds = array<i64: 1, 32>}, {transform_indices = @transform_18, window_bounds = array<i64: 1, 8, 32>}, {transform_indices = @transform_19, window_bounds = array<i64: 1, 8, 8>}]} {
    %c0 = arith.constant 0 : index
    %c0_0 = arith.constant 0 : index
    %c0_1 = arith.constant 0 : index
    %0 = vector.load %arg1[%c0, %c0_0, %c0_1] : memref<1x8x32xf32, #tpu.memory_space<vmem>>, vector<1x8x32xf32>
    %1 = vector.shape_cast %0 : vector<1x8x32xf32> to vector<8x32xf32>
    %c0_2 = arith.constant 0 : index
    %c0_3 = arith.constant 0 : index
    %c0_4 = arith.constant 0 : index
    %2 = vector.load %arg2[%c0_2, %c0_3, %c0_4] : memref<1x1x8xf32, #tpu.memory_space<vmem>>, vector<1x1x8xf32>
    %3 = vector.shape_cast %2 : vector<1x1x8xf32> to vector<1x8xf32>
    %c0_5 = arith.constant 0 : index
    %c0_6 = arith.constant 0 : index
    %4 = vector.load %arg3[%c0_5, %c0_6] : memref<1x32xf32, #tpu.memory_space<vmem>>, vector<1x32xf32>
    %c0_7 = arith.constant 0 : index
    %c0_8 = arith.constant 0 : index
    %5 = vector.load %arg4[%c0_7, %c0_8] : memref<1x32xf32, #tpu.memory_space<vmem>>, vector<1x32xf32>
    %cst = arith.constant dense<0.000000e+00> : vector<8xf32>
    %6 = vector.multi_reduction <add>, %1, %cst [1] : vector<8x32xf32> to vector<8xf32>
    %7 = vector.shape_cast %6 : vector<8xf32> to vector<8x1xf32>
    %cst_9 = arith.constant 3.200000e+01 : f32
    %8 = vector.broadcast %cst_9 : f32 to vector<8x1xf32>
    %9 = arith.divf %7, %8 : vector<8x1xf32>
    %10 = vector.broadcast %9 : vector<8x1xf32> to vector<8x32xf32>
    %11 = arith.subf %1, %10 : vector<8x32xf32>
    %12 = arith.mulf %11, %11 : vector<8x32xf32>
    %cst_10 = arith.constant dense<0.000000e+00> : vector<8xf32>
    %13 = vector.multi_reduction <add>, %12, %cst_10 [1] : vector<8x32xf32> to vector<8xf32>
    %14 = vector.shape_cast %13 : vector<8xf32> to vector<8x1xf32>
    %cst_11 = arith.constant 3.200000e+01 : f32
    %15 = vector.broadcast %cst_11 : f32 to vector<8x1xf32>
    %16 = arith.divf %14, %15 : vector<8x1xf32>
    %17 = vector.broadcast %9 : vector<8x1xf32> to vector<8x32xf32>
    %18 = arith.subf %1, %17 : vector<8x32xf32>
    %cst_12 = arith.constant 9.99999997E-7 : f32
    %19 = vector.broadcast %cst_12 : f32 to vector<8x1xf32>
    %20 = arith.addf %16, %19 : vector<8x1xf32>
    %21 = math.rsqrt %20 : vector<8x1xf32>
    %22 = vector.broadcast %21 : vector<8x1xf32> to vector<8x32xf32>
    %23 = arith.mulf %18, %22 : vector<8x32xf32>
    %24 = vector.broadcast %4 : vector<1x32xf32> to vector<8x32xf32>
    %25 = arith.mulf %23, %24 : vector<8x32xf32>
    %26 = vector.broadcast %5 : vector<1x32xf32> to vector<8x32xf32>
    %27 = arith.addf %25, %26 : vector<8x32xf32>
    %28 = arith.truncf %27 : vector<8x32xf32> to vector<8x32xbf16>
    %29 = vector.shape_cast %28 : vector<8x32xbf16> to vector<1x8x32xbf16>
    %30 = vector.shape_cast %29 : vector<1x8x32xbf16> to vector<1x8x32xbf16>
    %31 = vector.broadcast %30 : vector<1x8x32xbf16> to vector<4x8x32xbf16>
    %c0_13 = arith.constant 0 : index
    %c0_14 = arith.constant 0 : index
    %c0_15 = arith.constant 0 : index
    %32 = vector.load %arg5[%c0_13, %c0_14, %c0_15] : memref<4x32x8xbf16, #tpu.memory_space<vmem>>, vector<4x32x8xbf16>
    "tpu.trace_start"() <{level = 10 : i32, message = "hse,hed->hsd"}> : () -> ()
    %cst_16 = arith.constant dense<0.000000e+00> : vector<4x8x8xf32>
    %33 = tpu.matmul %31, %32, %cst_16 {dimension_numbers = #tpu.dot_dimension_numbers<[2], [1], [1], [2], [0, 0, 0, 1, 1, 2], [0], [0]>} : vector<4x8x32xbf16>, vector<4x32x8xbf16>, vector<4x8x8xf32> -> vector<4x8x8xf32>
    "tpu.trace_stop"() : () -> ()
    %c0_17 = arith.constant 0 : index
    %c0_18 = arith.constant 0 : index
    %c0_19 = arith.constant 0 : index
    %34 = vector.load %arg6[%c0_17, %c0_18, %c0_19] : memref<4x1x8xf32, #tpu.memory_space<vmem>>, vector<4x1x8xf32>
    %35 = vector.broadcast %34 : vector<4x1x8xf32> to vector<4x8x8xf32>
    %36 = arith.addf %33, %35 : vector<4x8x8xf32>
    %c0_20 = arith.constant 0 : index
    %c0_21 = arith.constant 0 : index
    %c0_22 = arith.constant 0 : index
    %37 = vector.load %arg7[%c0_20, %c0_21, %c0_22] : memref<4x32x8xbf16, #tpu.memory_space<vmem>>, vector<4x32x8xbf16>
    "tpu.trace_start"() <{level = 10 : i32, message = "hse,hed->hsd"}> : () -> ()
    %cst_23 = arith.constant dense<0.000000e+00> : vector<4x8x8xf32>
    %38 = tpu.matmul %31, %37, %cst_23 {dimension_numbers = #tpu.dot_dimension_numbers<[2], [1], [1], [2], [0, 0, 0, 1, 1, 2], [0], [0]>} : vector<4x8x32xbf16>, vector<4x32x8xbf16>, vector<4x8x8xf32> -> vector<4x8x8xf32>
    "tpu.trace_stop"() : () -> ()
    %c0_24 = arith.constant 0 : index
    %c0_25 = arith.constant 0 : index
    %c0_26 = arith.constant 0 : index
    %39 = vector.load %arg8[%c0_24, %c0_25, %c0_26] : memref<4x1x8xf32, #tpu.memory_space<vmem>>, vector<4x1x8xf32>
    %40 = vector.broadcast %39 : vector<4x1x8xf32> to vector<4x8x8xf32>
    %41 = arith.addf %38, %40 : vector<4x8x8xf32>
    %c0_27 = arith.constant 0 : index
    %c0_28 = arith.constant 0 : index
    %c0_29 = arith.constant 0 : index
    %42 = vector.load %arg9[%c0_27, %c0_28, %c0_29] : memref<4x32x8xbf16, #tpu.memory_space<vmem>>, vector<4x32x8xbf16>
    "tpu.trace_start"() <{level = 10 : i32, message = "hse,hed->hsd"}> : () -> ()
    %cst_30 = arith.constant dense<0.000000e+00> : vector<4x8x8xf32>
    %43 = tpu.matmul %31, %42, %cst_30 {dimension_numbers = #tpu.dot_dimension_numbers<[2], [1], [1], [2], [0, 0, 0, 1, 1, 2], [0], [0]>} : vector<4x8x32xbf16>, vector<4x32x8xbf16>, vector<4x8x8xf32> -> vector<4x8x8xf32>
    "tpu.trace_stop"() : () -> ()
    %c0_31 = arith.constant 0 : index
    %c0_32 = arith.constant 0 : index
    %c0_33 = arith.constant 0 : index
    %44 = vector.load %arg10[%c0_31, %c0_32, %c0_33] : memref<4x1x8xf32, #tpu.memory_space<vmem>>, vector<4x1x8xf32>
    %45 = vector.broadcast %44 : vector<4x1x8xf32> to vector<4x8x8xf32>
    %46 = arith.addf %43, %45 : vector<4x8x8xf32>
    %47 = arith.truncf %36 : vector<4x8x8xf32> to vector<4x8x8xbf16>
    %48 = arith.truncf %41 : vector<4x8x8xf32> to vector<4x8x8xbf16>
    "tpu.trace_start"() <{level = 10 : i32, message = "hqd,hkd->hqk"}> : () -> ()
    %cst_34 = arith.constant dense<0.000000e+00> : vector<4x8x8xf32>
    %49 = tpu.matmul %47, %48, %cst_34 {dimension_numbers = #tpu.dot_dimension_numbers<[2], [2], [1], [1], [0, 0, 0, 1, 1, 1], [0], [0]>} : vector<4x8x8xbf16>, vector<4x8x8xbf16>, vector<4x8x8xf32> -> vector<4x8x8xf32>
    "tpu.trace_stop"() : () -> ()
    %50 = vector.shape_cast %3 : vector<1x8xf32> to vector<1x1x8xf32>
    %51 = vector.broadcast %50 : vector<1x1x8xf32> to vector<4x8x8xf32>
    %52 = arith.addf %49, %51 : vector<4x8x8xf32>
    %cst_35 = arith.constant dense<0xFF800000> : vector<4x8xf32>
    %53 = vector.multi_reduction <maximumf>, %52, %cst_35 [2] : vector<4x8x8xf32> to vector<4x8xf32>
    %54 = vector.shape_cast %53 : vector<4x8xf32> to vector<4x8x1xf32>
    %55 = vector.broadcast %54 : vector<4x8x1xf32> to vector<4x8x8xf32>
    %56 = arith.subf %52, %55 : vector<4x8x8xf32>
    %57 = math.exp %56 : vector<4x8x8xf32>
    %cst_36 = arith.constant dense<0.000000e+00> : vector<4x8xf32>
    %58 = vector.multi_reduction <add>, %57, %cst_36 [2] : vector<4x8x8xf32> to vector<4x8xf32>
    %59 = vector.shape_cast %58 : vector<4x8xf32> to vector<4x8x1xf32>
    %60 = tpu.reciprocal %59 {approx = true} : vector<4x8x1xf32> -> vector<4x8x1xf32>
    %61 = arith.truncf %57 : vector<4x8x8xf32> to vector<4x8x8xbf16>
    %62 = arith.truncf %46 : vector<4x8x8xf32> to vector<4x8x8xbf16>
    "tpu.trace_start"() <{level = 10 : i32, message = "hqk,hkd->hqd"}> : () -> ()
    %cst_37 = arith.constant dense<0.000000e+00> : vector<4x8x8xf32>
    %63 = tpu.matmul %61, %62, %cst_37 {dimension_numbers = #tpu.dot_dimension_numbers<[2], [1], [1], [2], [0, 0, 0, 1, 1, 2], [0], [0]>} : vector<4x8x8xbf16>, vector<4x8x8xbf16>, vector<4x8x8xf32> -> vector<4x8x8xf32>
    "tpu.trace_stop"() : () -> ()
    %64 = vector.broadcast %60 : vector<4x8x1xf32> to vector<4x8x8xf32>
    %65 = arith.mulf %63, %64 : vector<4x8x8xf32>
    %66 = arith.truncf %65 : vector<4x8x8xf32> to vector<4x8x8xbf16>
    %c0_38 = arith.constant 0 : index
    %c0_39 = arith.constant 0 : index
    %c0_40 = arith.constant 0 : index
    %67 = vector.load %arg11[%c0_38, %c0_39, %c0_40] : memref<4x8x32xbf16, #tpu.memory_space<vmem>>, vector<4x8x32xbf16>
    "tpu.trace_start"() <{level = 10 : i32, message = "hsd,hde->hse"}> : () -> ()
    %cst_41 = arith.constant dense<0.000000e+00> : vector<4x8x32xf32>
    %68 = tpu.matmul %66, %67, %cst_41 {dimension_numbers = #tpu.dot_dimension_numbers<[2], [1], [1], [2], [0, 0, 0, 1, 1, 2], [0], [0]>} : vector<4x8x8xbf16>, vector<4x8x32xbf16>, vector<4x8x32xf32> -> vector<4x8x32xf32>
    "tpu.trace_stop"() : () -> ()
    %cst_42 = arith.constant dense<0.000000e+00> : vector<8x32xf32>
    %69 = vector.multi_reduction <add>, %68, %cst_42 [0] : vector<4x8x32xf32> to vector<8x32xf32>
    %c0_43 = arith.constant 0 : index
    %c0_44 = arith.constant 0 : index
    %70 = vector.load %arg12[%c0_43, %c0_44] : memref<1x32xf32, #tpu.memory_space<vmem>>, vector<1x32xf32>
    %71 = vector.broadcast %70 : vector<1x32xf32> to vector<8x32xf32>
    %72 = arith.addf %69, %71 : vector<8x32xf32>
    %73 = arith.addf %1, %72 : vector<8x32xf32>
    %c0_45 = arith.constant 0 : index
    %c0_46 = arith.constant 0 : index
    %74 = vector.load %arg13[%c0_45, %c0_46] : memref<1x32xf32, #tpu.memory_space<vmem>>, vector<1x32xf32>
    %c0_47 = arith.constant 0 : index
    %c0_48 = arith.constant 0 : index
    %75 = vector.load %arg14[%c0_47, %c0_48] : memref<1x32xf32, #tpu.memory_space<vmem>>, vector<1x32xf32>
    %cst_49 = arith.constant dense<0.000000e+00> : vector<8xf32>
    %76 = vector.multi_reduction <add>, %73, %cst_49 [1] : vector<8x32xf32> to vector<8xf32>
    %77 = vector.shape_cast %76 : vector<8xf32> to vector<8x1xf32>
    %cst_50 = arith.constant 3.200000e+01 : f32
    %78 = vector.broadcast %cst_50 : f32 to vector<8x1xf32>
    %79 = arith.divf %77, %78 : vector<8x1xf32>
    %80 = vector.broadcast %79 : vector<8x1xf32> to vector<8x32xf32>
    %81 = arith.subf %73, %80 : vector<8x32xf32>
    %82 = arith.mulf %81, %81 : vector<8x32xf32>
    %cst_51 = arith.constant dense<0.000000e+00> : vector<8xf32>
    %83 = vector.multi_reduction <add>, %82, %cst_51 [1] : vector<8x32xf32> to vector<8xf32>
    %84 = vector.shape_cast %83 : vector<8xf32> to vector<8x1xf32>
    %cst_52 = arith.constant 3.200000e+01 : f32
    %85 = vector.broadcast %cst_52 : f32 to vector<8x1xf32>
    %86 = arith.divf %84, %85 : vector<8x1xf32>
    %87 = vector.broadcast %79 : vector<8x1xf32> to vector<8x32xf32>
    %88 = arith.subf %73, %87 : vector<8x32xf32>
    %cst_53 = arith.constant 9.99999997E-7 : f32
    %89 = vector.broadcast %cst_53 : f32 to vector<8x1xf32>
    %90 = arith.addf %86, %89 : vector<8x1xf32>
    %91 = math.rsqrt %90 : vector<8x1xf32>
    %92 = vector.broadcast %91 : vector<8x1xf32> to vector<8x32xf32>
    %93 = arith.mulf %88, %92 : vector<8x32xf32>
    %94 = vector.broadcast %74 : vector<1x32xf32> to vector<8x32xf32>
    %95 = arith.mulf %93, %94 : vector<8x32xf32>
    %96 = vector.broadcast %75 : vector<1x32xf32> to vector<8x32xf32>
    %97 = arith.addf %95, %96 : vector<8x32xf32>
    %98 = arith.truncf %97 : vector<8x32xf32> to vector<8x32xbf16>
    %c0_54 = arith.constant 0 : index
    %c0_55 = arith.constant 0 : index
    %99 = vector.load %arg15[%c0_54, %c0_55] : memref<32x64xbf16, #tpu.memory_space<vmem>>, vector<32x64xbf16>
    %cst_56 = arith.constant dense<0.000000e+00> : vector<8x64xf32>
    %100 = tpu.matmul %98, %99, %cst_56 {dimension_numbers = #tpu.dot_dimension_numbers<[1], [0], [0], [1], [0, 0, 1, 1], [], []>} : vector<8x32xbf16>, vector<32x64xbf16>, vector<8x64xf32> -> vector<8x64xf32>
    %c0_57 = arith.constant 0 : index
    %c0_58 = arith.constant 0 : index
    %101 = vector.load %arg16[%c0_57, %c0_58] : memref<1x64xf32, #tpu.memory_space<vmem>>, vector<1x64xf32>
    %102 = vector.broadcast %101 : vector<1x64xf32> to vector<8x64xf32>
    %103 = arith.addf %100, %102 : vector<8x64xf32>
    %cst_59 = arith.constant 0.000000e+00 : f32
    %104 = vector.broadcast %cst_59 : f32 to vector<8x64xf32>
    %105 = arith.maximumf %103, %104 : vector<8x64xf32>
    %106 = arith.truncf %105 : vector<8x64xf32> to vector<8x64xbf16>
    %c0_60 = arith.constant 0 : index
    %c0_61 = arith.constant 0 : index
    %107 = vector.load %arg17[%c0_60, %c0_61] : memref<64x32xbf16, #tpu.memory_space<vmem>>, vector<64x32xbf16>
    %cst_62 = arith.constant dense<0.000000e+00> : vector<8x32xf32>
    %108 = tpu.matmul %106, %107, %cst_62 {dimension_numbers = #tpu.dot_dimension_numbers<[1], [0], [0], [1], [0, 0, 1, 1], [], []>} : vector<8x64xbf16>, vector<64x32xbf16>, vector<8x32xf32> -> vector<8x32xf32>
    %c0_63 = arith.constant 0 : index
    %c0_64 = arith.constant 0 : index
    %109 = vector.load %arg18[%c0_63, %c0_64] : memref<1x32xf32, #tpu.memory_space<vmem>>, vector<1x32xf32>
    %110 = vector.broadcast %109 : vector<1x32xf32> to vector<8x32xf32>
    %111 = arith.addf %108, %110 : vector<8x32xf32>
    %112 = arith.addf %73, %111 : vector<8x32xf32>
    %c0_65 = arith.constant 0 : index
    %c0_66 = arith.constant 0 : index
    %c0_67 = arith.constant 0 : index
    %113 = vector.load %arg19[%c0_65, %c0_66, %c0_67] : memref<1x8x32xf32, #tpu.memory_space<vmem>>, vector<1x8x32xf32>
    %114 = vector.shape_cast %113 : vector<1x8x32xf32> to vector<8x32xf32>
    %115 = vector.shape_cast %112 : vector<8x32xf32> to vector<1x8x32xf32>
    tpu.vector_store %arg19[%c0_65, %c0_66, %c0_67], %115 {strides = array<i32>} : memref<1x8x32xf32, #tpu.memory_space<vmem>>, vector<1x8x32xf32>,
    %116 = vector.broadcast %60 : vector<4x8x1xf32> to vector<4x8x8xf32>
    %117 = arith.mulf %57, %116 : vector<4x8x8xf32>
    %cst_68 = arith.constant dense<0.000000e+00> : vector<8x8xf32>
    %118 = vector.multi_reduction <add>, %117, %cst_68 [0] : vector<4x8x8xf32> to vector<8x8xf32>
    %cst_69 = arith.constant 2.500000e-01 : f32
    %119 = vector.broadcast %cst_69 : f32 to vector<8x8xf32>
    %120 = arith.mulf %118, %119 : vector<8x8xf32>
    %c0_70 = arith.constant 0 : index
    %c0_71 = arith.constant 0 : index
    %c0_72 = arith.constant 0 : index
    %121 = vector.load %arg20[%c0_70, %c0_71, %c0_72] : memref<1x8x8xf32, #tpu.memory_space<vmem>>, vector<1x8x8xf32>
    %122 = vector.shape_cast %121 : vector<1x8x8xf32> to vector<8x8xf32>
    %123 = vector.shape_cast %120 : vector<8x8xf32> to vector<1x8x8xf32>
    tpu.vector_store %arg20[%c0_70, %c0_71, %c0_72], %123 {strides = array<i32>} : memref<1x8x8xf32, #tpu.memory_space<vmem>>, vector<1x8x8xf32>,
    return
  }
  func.func @transform_0(%arg0: i32) -> (i32, i32, i32) {
    %c0_i32 = arith.constant 0 : i32
    %c0_i32_0 = arith.constant 0 : i32
    %c0_i32_1 = arith.constant 0 : i32
    return %arg0, %c0_i32, %c0_i32_0 : i32, i32, i32
  }
  func.func @transform_1(%arg0: i32) -> (i32, i32, i32) {
    %c0_i32 = arith.constant 0 : i32
    %c0_i32_0 = arith.constant 0 : i32
    %c0_i32_1 = arith.constant 0 : i32
    return %arg0, %c0_i32, %c0_i32_0 : i32, i32, i32
  }
  func.func @transform_2(%arg0: i32) -> (i32, i32) {
    %c0_i32 = arith.constant 0 : i32
    %c0_i32_0 = arith.constant 0 : i32
    %c0_i32_1 = arith.constant 0 : i32
    return %c0_i32, %c0_i32_0 : i32, i32
  }
  func.func @transform_3(%arg0: i32) -> (i32, i32) {
    %c0_i32 = arith.constant 0 : i32
    %c0_i32_0 = arith.constant 0 : i32
    %c0_i32_1 = arith.constant 0 : i32
    return %c0_i32, %c0_i32_0 : i32, i32
  }
  func.func @transform_4(%arg0: i32) -> (i32, i32, i32) {
    %c0_i32 = arith.constant 0 : i32
    %c0_i32_0 = arith.constant 0 : i32
    %c0_i32_1 = arith.constant 0 : i32
    %c0_i32_2 = arith.constant 0 : i32
    return %c0_i32, %c0_i32_0, %c0_i32_1 : i32, i32, i32
  }
  func.func @transform_5(%arg0: i32) -> (i32, i32, i32) {
    %c0_i32 = arith.constant 0 : i32
    %c0_i32_0 = arith.constant 0 : i32
    %c0_i32_1 = arith.constant 0 : i32
    %c0_i32_2 = arith.constant 0 : i32
    return %c0_i32, %c0_i32_0, %c0_i32_1 : i32, i32, i32
  }
  func.func @transform_6(%arg0: i32) -> (i32, i32, i32) {
    %c0_i32 = arith.constant 0 : i32
    %c0_i32_0 = arith.constant 0 : i32
    %c0_i32_1 = arith.constant 0 : i32
    %c0_i32_2 = arith.constant 0 : i32
    return %c0_i32, %c0_i32_0, %c0_i32_1 : i32, i32, i32
  }
  func.func @transform_7(%arg0: i32) -> (i32, i32, i32) {
    %c0_i32 = arith.constant 0 : i32
    %c0_i32_0 = arith.constant 0 : i32
    %c0_i32_1 = arith.constant 0 : i32
    %c0_i32_2 = arith.constant 0 : i32
    return %c0_i32, %c0_i32_0, %c0_i32_1 : i32, i32, i32
  }
  func.func @transform_8(%arg0: i32) -> (i32, i32, i32) {
    %c0_i32 = arith.constant 0 : i32
    %c0_i32_0 = arith.constant 0 : i32
    %c0_i32_1 = arith.constant 0 : i32
    %c0_i32_2 = arith.constant 0 : i32
    return %c0_i32, %c0_i32_0, %c0_i32_1 : i32, i32, i32
  }
  func.func @transform_9(%arg0: i32) -> (i32, i32, i32) {
    %c0_i32 = arith.constant 0 : i32
    %c0_i32_0 = arith.constant 0 : i32
    %c0_i32_1 = arith.constant 0 : i32
    %c0_i32_2 = arith.constant 0 : i32
    return %c0_i32, %c0_i32_0, %c0_i32_1 : i32, i32, i32
  }
  func.func @transform_10(%arg0: i32) -> (i32, i32, i32) {
    %c0_i32 = arith.constant 0 : i32
    %c0_i32_0 = arith.constant 0 : i32
    %c0_i32_1 = arith.constant 0 : i32
    %c0_i32_2 = arith.constant 0 : i32
    return %c0_i32, %c0_i32_0, %c0_i32_1 : i32, i32, i32
  }
  func.func @transform_11(%arg0: i32) -> (i32, i32) {
    %c0_i32 = arith.constant 0 : i32
    %c0_i32_0 = arith.constant 0 : i32
    %c0_i32_1 = arith.constant 0 : i32
    return %c0_i32, %c0_i32_0 : i32, i32
  }
  func.func @transform_12(%arg0: i32) -> (i32, i32) {
    %c0_i32 = arith.constant 0 : i32
    %c0_i32_0 = arith.constant 0 : i32
    %c0_i32_1 = arith.constant 0 : i32
    return %c0_i32, %c0_i32_0 : i32, i32
  }
  func.func @transform_13(%arg0: i32) -> (i32, i32) {
    %c0_i32 = arith.constant 0 : i32
    %c0_i32_0 = arith.constant 0 : i32
    %c0_i32_1 = arith.constant 0 : i32
    return %c0_i32, %c0_i32_0 : i32, i32
  }
  func.func @transform_14(%arg0: i32) -> (i32, i32) {
    %c0_i32 = arith.constant 0 : i32
    %c0_i32_0 = arith.constant 0 : i32
    %c0_i32_1 = arith.constant 0 : i32
    return %c0_i32, %c0_i32_0 : i32, i32
  }
  func.func @transform_15(%arg0: i32) -> (i32, i32) {
    %c0_i32 = arith.constant 0 : i32
    %c0_i32_0 = arith.constant 0 : i32
    %c0_i32_1 = arith.constant 0 : i32
    return %c0_i32, %c0_i32_0 : i32, i32
  }
  func.func @transform_16(%arg0: i32) -> (i32, i32) {
    %c0_i32 = arith.constant 0 : i32
    %c0_i32_0 = arith.constant 0 : i32
    %c0_i32_1 = arith.constant 0 : i32
    return %c0_i32, %c0_i32_0 : i32, i32
  }
  func.func @transform_17(%arg0: i32) -> (i32, i32) {
    %c0_i32 = arith.constant 0 : i32
    %c0_i32_0 = arith.constant 0 : i32
    %c0_i32_1 = arith.constant 0 : i32
    return %c0_i32, %c0_i32_0 : i32, i32
  }
  func.func @transform_18(%arg0: i32) -> (i32, i32, i32) {
    %c0_i32 = arith.constant 0 : i32
    %c0_i32_0 = arith.constant 0 : i32
    %c0_i32_1 = arith.constant 0 : i32
    return %arg0, %c0_i32, %c0_i32_0 : i32, i32, i32
  }
  func.func @transform_19(%arg0: i32) -> (i32, i32, i32) {
    %c0_i32 = arith.constant 0 : i32
    %c0_i32_0 = arith.constant 0 : i32
    %c0_i32_1 = arith.constant 0 : i32
    return %arg0, %c0_i32, %c0_i32_0 : i32, i32, i32
  }
}

</mosaic_0001>

<bundles_post_ra>
// kernel: tpu_custom_call.1
= control target key start
LH: loop header
LB: loop body
LE: loop exit
PB: predicated region body
PF: predicated region fallthrough
CT: control target
= control target key end

     0   :  { %s3512_s0 = inlined_call_operand.vmem [shape: f32[2,8,32], index: 0, kind: input, shape index: {}]   ;;  %s3513_s1 = inlined_call_operand.vmem [shape: f32[2,1,8], index: 1, kind: input, shape index: {}]   ;;  %s3514_s2 = inlined_call_operand.vmem [shape: f32[1,32], index: 2, kind: input, shape index: {}]   ;;  %s3515_s3 = inlined_call_operand.vmem [shape: f32[1,32], index: 3, kind: input, shape index: {}]   ;;  %s3516_s4 = inlined_call_operand.vmem [shape: bf16[4,32,8], index: 4, kind: input, shape index: {}]   ;;  %s3517_s5 = inlined_call_operand.vmem [shape: f32[4,1,8], index: 5, kind: input, shape index: {}]   ;;  %s3518_s6 = inlined_call_operand.vmem [shape: bf16[4,32,8], index: 6, kind: input, shape index: {}]   ;;  %s3519_s7 = inlined_call_operand.vmem [shape: f32[4,1,8], index: 7, kind: input, shape index: {}]   ;;  %s3520_s8 = inlined_call_operand.vmem [shape: bf16[4,32,8], index: 8, kind: input, shape index: {}]   ;;  %s3521_s9 = inlined_call_operand.vmem [shape: f32[4,1,8], index: 9, kind: input, shape index: {}]   ;;  %s3522_s10 = inlined_call_operand.vmem [shape: bf16[4,8,32], index: 10, kind: input, shape index: {}]   ;;  %s3523_s11 = inlined_call_operand.vmem [shape: f32[1,32], index: 11, kind: input, shape index: {}]   ;;  %s3524_s12 = inlined_call_operand.vmem [shape: f32[1,32], index: 12, kind: input, shape index: {}]   ;;  %s3525_s13 = inlined_call_operand.vmem [shape: f32[1,32], index: 13, kind: input, shape index: {}]   ;;  %s3526_s14 = inlined_call_operand.vmem [shape: bf16[32,64], index: 14, kind: input, shape index: {}]   ;;  %s3527_s15 = inlined_call_operand.vmem [shape: f32[1,64], index: 15, kind: input, shape index: {}]   ;;  %s3528_s16 = inlined_call_operand.vmem [shape: bf16[64,32], index: 16, kind: input, shape index: {}]   ;;  %s3529_s17 = inlined_call_operand.vmem [shape: f32[1,32], index: 17, kind: input, shape index: {}]   ;;  %s3530_s18 = inlined_call_operand.hbm [shape: f32[2,8,32], index: 18, kind: output, shape index: {0}]   ;;  %s3531_s19 = inlined_call_operand.hbm [shape: f32[2,8,8], index: 19, kind: output, shape index: {1}]  }
   0x1   :  { %3539 = sst [smem:[#allocation13_spill]] %s3512_s0 }
   0x2   :  { %3540 = sst [smem:[#allocation14_spill]] %s3513_s1 }
   0x3   :  { %3541 = sst [smem:[#allocation15_spill]] %s3514_s2 }
   0x4   :  { %3542 = sst [smem:[#allocation16_spill]] %s3515_s3 }
   0x5   :  { %3543 = sst [smem:[#allocation17_spill]] %s3516_s4 }
   0x6   :  { %25 = vsyncpa [#allocation3], 0 }
   0x7   :  { %27 = vsyncpa [#allocation3 + $0x1], 0 }
   0x8   :  { %28 = vsyncpa [#allocation5], 0 }
   0x9   :  { %30 = vsyncpa [#allocation5 + $0x1], 0  ;;  %s3030_s0 = smov 0   ;;  %s3032_s30 = smov 0  }
   0xa   :  { %s3034_s20 = smov 0   ;;  %s3036_s21 = smov 0  }
   0xb LB: > { %3544 = sst [smem:[#allocation8_spill]] %s2912_s0  ;;  %s3051_s1 = sadd.s32 4294967295, %s2924_s21   ;;  %s2924_s21 = sphi %s3036_s21, %s3560_s21   ;;  %s2920_s20 = sphi %s3034_s20, %s3562_s20   ;;  %s2916_s30 = sphi %s3032_s30, %s3564_s30   ;;  %s2912_s0 = sphi %s3030_s0, %s3563_s0  }
   0xc   : > { %3545 = sst [smem:[#allocation9_spill]] %s2920_s20  ;;  %s2389_s22 = sadd.s32 4294967294, %s2924_s21  }
   0xd   : > { %s3055_s2 = sadd.s32 1, %s2924_s21   ;;  %s431_s23 = sadd.s32 1, %s2920_s20 }
   0xe   : > { %3546 = sst [smem:[#allocation10_spill]] %s3055_s2  ;;  %s428_s24 = ssub.s32 %s2924_s21, %s3055_s2 }
   0xf   : > { %p441_p0 = scmp.ne.s32.totalorder %s2920_s20, %s2916_s30  ;;  %p429_p1 = scmp.eq.s32.totalorder %s428_s24, 0 }
  0x10   : > { %p442_p2 = scmp.eq.s32.totalorder %s3051_s1, 1  ;;  %p447_p3 = scmp.ne.s32.totalorder %s2916_s30, %s2912_s0 }
  0x11   : > { %p448_p4 = scmp.eq.s32.totalorder %s2389_s22, 1  ;;  %p2392_p7 = scmp.ge.s32.totalorder %s2924_s21, 1 }
  0x12   : > { %s3066_s25 = scalar_select %p429_p1, %s2920_s20, %s431_s23  }
  0x13   : > { %p3068_p5 = por %p442_p2, %p441_p0  ;;  %p3072_p6 = por %p448_p4, %p447_p3 }
  0x14   : > { %3547 = sst [smem:[#allocation11_spill]] %s3066_s25  ;;  %p553_p8 = scmp.lt.s32.totalorder %s2924_s21, 3 }
  0x15   : > { %s3549_s26 = scalar_select %p3072_p6, 1, 0 }
  0x16   : > { %p554_p9 = pnand %p2392_p7, %p553_p8 }
  0x17   : > { %3550 = sst [smem:[#allocation12_spill]] %s3549_s26  ;;  %p616_p10 = scmp.lt.s32.totalorder (!%p554_p9), %s3051_s1, 1  ;;  %vm628_vm0 = vcmask (!%p554_p9), 261120   ;;  %v2926_v9 = vmov (!%p554_p9), 0.0   ;;  %vm2927_vm1 = vmmov (!%p554_p9), 0   ;;  %v2788_v26 = vld [vmem:[%s3518_s6] sm:$0xff] (!%p554_p9)  }
  0x18   : > { %557 = sbr.rel (%p554_p9) target bundleno = 2175 (0x87f), region = 92  ;;  %s3551_s23 = sld [smem:[#allocation13_spill]] (!%p554_p9)  ;;  %2546 = vmatprep.subr.bf16.mxu0 (!%p554_p9), %v2926_v9  ;;  %2554 = vmatprep.subr.bf16.mxu1 (!%p554_p9), %v2926_v9  ;;  %v2789_v27 = vld [vmem:[%s3518_s6 + $0x10] sm:$0xff] (!%p554_p9)   ;;  %v2790_v28 = vld [vmem:[%s3518_s6 + $0x8] sm:$0xff] (!%p554_p9)   ;;  %v2791_v29 = vld [vmem:[%s3518_s6 + $0x18] sm:$0xff] (!%p554_p9)   ;;  %vm1431_vm2 = vcmask (!%p554_p9), 64512  }
  0x19   : > { %s3552_s4 = sld [smem:[#allocation17_spill]] (!%p554_p9)  ;;  %2550 = vmatprep.mubr.msk.bf16.mxu0 (!%p554_p9), %vm2927_vm1, %v2926_v9  ;;  %2558 = vmatprep.mubr.msk.bf16.mxu1 (!%p554_p9), %vm2927_vm1, %v2926_v9  ;;  %s3554_s20 = sld [smem:[#allocation16_spill]] (!%p554_p9)  ;;  %v2792_v30 = vld [vmem:[%s3518_s6 + $0x20] sm:$0xff] (!%p554_p9)   ;;  %v2793_v31 = vld [vmem:[%s3518_s6 + $0x30] sm:$0xff] (!%p554_p9)   ;;  %v2794_v32 = vld [vmem:[%s3518_s6 + $0x28] sm:$0xff] (!%p554_p9)   ;;  %vm1667_vm3 = vcmask (!%p554_p9), 1043456  }
  0x1a   : > { %v2795_v33 = vld [vmem:[%s3518_s6 + $0x38] sm:$0xff] (!%p554_p9)   ;;  %v2796_v34 = vld [vmem:[%s3520_s8] sm:$0xff] (!%p554_p9)   ;;  %v2797_v35 = vld [vmem:[%s3520_s8 + $0x10] sm:$0xff] (!%p554_p9)   ;;  %vm2198_vm4 = vcmask (!%p554_p9), 523264   ;;  %s2928_s22 = smov (!%p554_p9), [#allocation4]  }
  0x1b   : > { %v2798_v36 = vld [vmem:[%s3520_s8 + $0x8] sm:$0xff] (!%p554_p9)   ;;  %v2799_v37 = vld [vmem:[%s3520_s8 + $0x18] sm:$0xff] (!%p554_p9)   ;;  %v2800_v38 = vld [vmem:[%s3520_s8 + $0x20] sm:$0xff] (!%p554_p9)  }
  0x1c   : > { %v2801_v39 = vld [vmem:[%s3520_s8 + $0x30] sm:$0xff] (!%p554_p9)   ;;  %v2802_v40 = vld [vmem:[%s3520_s8 + $0x28] sm:$0xff] (!%p554_p9)   ;;  %v2803_v41 = vld [vmem:[%s3520_s8 + $0x38] sm:$0xff] (!%p554_p9)  }
  0x1d   : > { %v2414_v58 = vld [vmem:[%s3519_s7] ss:$0 sm:$0xff] (!%p554_p9)  ;;  %v2415_v59 = vld [vmem:[%s3519_s7 + $0x1] ss:$0 sm:$0xff] (!%p554_p9) }
  0x1f   : > { %s3080_s27 = scalar_select %p616_p10, %s3051_s1, 1  ;;  %v2780_v7 = vld [vmem:[%s3552_s4] sm:$0xff]   ;;  %v2781_v8 = vld [vmem:[%s3552_s4 + $0x10] sm:$0xff]   ;;  %v2782_v10 = vld [vmem:[%s3552_s4 + $0x8] sm:$0xff]  }
  0x20   : > { %2547 = vmatpush3.bf16.msra.mxu0 %v2780_v7  ;;  %2555 = vmatpush3.bf16.msra.mxu1 %v2781_v8  ;;  %v2783_v11 = vld [vmem:[%s3552_s4 + $0x18] sm:$0xff]   ;;  %v2397_v18 = vld [vmem:[%s3554_s20] ss:$0 sm:$0xff]  ;;  %v2785_v22 = vld [vmem:[%s3552_s4 + $0x30] sm:$0xff]   ;;  %s3555_s20 = sld [smem:[#allocation14_spill]] }
  0x21   : > { %s2395_s28 = sshll.u32 %s3080_s27, 3  ;;  %2548 = vmatprep.subr.bf16.mxu0 %v2926_v9  ;;  %2556 = vmatprep.subr.bf16.mxu1 %v2926_v9  ;;  %v2784_v21 = vld [vmem:[%s3552_s4 + $0x20] sm:$0xff]   ;;  %v2786_v24 = vld [vmem:[%s3552_s4 + $0x28] sm:$0xff]   ;;  %v2787_v25 = vld [vmem:[%s3552_s4 + $0x38] sm:$0xff]  }
  0x22   : > { %s619_s24 = scalar_lea.vmem %s3551_s23, %s2395_s28  ;;  %s3553_s28 = sld [smem:[#allocation15_spill]] }
  0x23   : > { %v3086_v0 = vld [vmem:[%s619_s24] sm:$0xff]  ;;  %s3350_s23 = sand.u32 1, %s2916_s30  }
  0x24   : > { %v629_v1 = vsel %vm628_vm0, %v3086_v0, 0.0  ;;  %2549 = vmatpush3.bf16.msra.mxu0 %v2782_v10  ;;  %2557 = vmatpush3.bf16.msra.mxu1 %v2783_v11  ;;  %v2398_v10 = vld [vmem:[%s3517_s5] ss:$0 sm:$0xff]  ;;  %v2399_v11 = vld [vmem:[%s3517_s5 + $0x1] ss:$0 sm:$0xff]  ;;  %s2263_s0 = scalar_lea.sflag [#allocation5], %s3350_s23 }
  0x25   : > { %630 = vadd.xlane.f32.xlu0 %v629_v1  ;;  %2562 = vmatprep.subr.bf16.mxu0 %v2926_v9 }
  0x26   : > { %2570 = vmatprep.subr.bf16.mxu1 %v2926_v9  ;;  %s622_s25 = scalar_lea.vmem %s3555_s20, %s3080_s27  ;;  %s3537_s20 = sshll.u32 %s3350_s23, 3 }
  0x27   : > { %s3538_s27 = sshll.u32 %s3051_s1, 7 }
  0x28   : > { %v2396_v16 = vld [vmem:[%s3553_s28] ss:$0 sm:$0xff]  ;;  %s3436_s2 = scalar_lea.hbm %s3531_s19, %s3538_s27 }
  0xb2   : > { %v631_v2 = vpop.xlane.xlu0 %630 }
  0xb3   : > { %v633_v3 = vmul.f32 0.03125, %v631_v2 }
  0xb5   : > { %v634_v4 = vsub.f32 %v3086_v0, %v633_v3 }
  0xb7   : > { %v635_v5 = vmul.f32 %v634_v4, %v634_v4 }
  0xb9   : > { %v636_v6 = vsel %vm628_vm0, %v635_v5, 0.0 }
  0xba   : > { %637 = vadd.xlane.f32.xlu0 %v636_v6 }
 0x147   : > { %v638_v12 = vpop.xlane.xlu0 %637 }
 0x148   : > { %v639_v13 = vmul.f32 0.03125, %v638_v12 }
 0x14a   : > { %v640_v14 = vadd.f32 1e-06, %v639_v13 }
 0x14c   : > { %2810 = vrsqrt.f32 %v640_v14  ;;  %v2416_v14 = vld [vmem:[%s3519_s7 + $0x2] ss:$0 sm:$0xff] }
 0x156   : > { %v2811_v15 = vpop.eup %2810 }
 0x157   : > { %v642_v17 = vmul.f32 %v2811_v15, %v634_v4  ;;  %v2417_v15 = vld [vmem:[%s3519_s7 + $0x3] ss:$0 sm:$0xff] }
 0x159   : > { %v649_v19 = vmul.f32 %v2396_v16, %v642_v17 }
 0x15b   : > { %v656_v20 = vadd.f32 %v2397_v18, %v649_v19 }
 0x15d   : > { %v3126_v23 = vpack.c.bf16 %v656_v20, %v656_v20 }
 0x15f   : > { %2551 = vmatmul.mubr.msk.bf16.vlgmr.msra.gmra.mrb[0].mxu0 %vm628_vm0, %v3126_v23  ;;  %2559 = vmatmul.mubr.msk.bf16.vlgmr.msra.gmra.mrb[0].mxu1 %vm628_vm0, %v3126_v23 }
 0x160   : > { %2563 = vmatpush3.bf16.msra.mxu0 %v2784_v21  ;;  %2571 = vmatpush3.bf16.msra.mxu1 %v2785_v22 }
 0x161   : > { %2564 = vmatprep.subr.bf16.mxu0 %v2926_v9  ;;  %2572 = vmatprep.subr.bf16.mxu1 %v2926_v9 }
 0x162   : > { %2566 = vmatprep.mubr.msk.bf16.mxu0 %vm2927_vm1, %v2926_v9  ;;  %2574 = vmatprep.mubr.msk.bf16.mxu1 %vm2927_vm1, %v2926_v9 }
 0x164   : > { %2565 = vmatpush3.bf16.msra.mxu0 %v2786_v24  ;;  %2573 = vmatpush3.bf16.msra.mxu1 %v2787_v25 }
 0x165   : > { %2578 = vmatprep.subr.bf16.mxu0 %v2926_v9  ;;  %2586 = vmatprep.subr.bf16.mxu1 %v2926_v9 }
 0x167   : > { %2567 = vmatmul.mubr.msk.bf16.vlgmr.msra.gmra.mrb[4].mxu0 %vm628_vm0, %v3126_v23  ;;  %2575 = vmatmul.mubr.msk.bf16.vlgmr.msra.gmra.mrb[4].mxu1 %vm628_vm0, %v3126_v23 }
 0x168   : > { %2579 = vmatpush3.bf16.msra.mxu0 %v2788_v26  ;;  %2587 = vmatpush3.bf16.msra.mxu1 %v2789_v27 }
 0x169   : > { %2580 = vmatprep.subr.bf16.mxu0 %v2926_v9  ;;  %2588 = vmatprep.subr.bf16.mxu1 %v2926_v9 }
 0x16a   : > { %2582 = vmatprep.mubr.msk.bf16.mxu0 %vm2927_vm1, %v2926_v9  ;;  %2590 = vmatprep.mubr.msk.bf16.mxu1 %vm2927_vm1, %v2926_v9 }
 0x16c   : > { %2581 = vmatpush3.bf16.msra.mxu0 %v2790_v28  ;;  %2589 = vmatpush3.bf16.msra.mxu1 %v2791_v29 }
 0x16d   : > { %2594 = vmatprep.subr.bf16.mxu0 %v2926_v9  ;;  %2602 = vmatprep.subr.bf16.mxu1 %v2926_v9 }
 0x16f   : > { %2583 = vmatmul.mubr.msk.bf16.vlgmr.msra.gmra.mrb[8].mxu0 %vm628_vm0, %v3126_v23  ;;  %2591 = vmatmul.mubr.msk.bf16.vlgmr.msra.gmra.mrb[8].mxu1 %vm628_vm0, %v3126_v23 }
 0x170   : > { %2595 = vmatpush3.bf16.msra.mxu0 %v2792_v30  ;;  %2603 = vmatpush3.bf16.msra.mxu1 %v2793_v31 }
 0x171   : > { %2596 = vmatprep.subr.bf16.mxu0 %v2926_v9  ;;  %2604 = vmatprep.subr.bf16.mxu1 %v2926_v9 }
 0x172   : > { %2598 = vmatprep.mubr.msk.bf16.mxu0 %vm2927_vm1, %v2926_v9  ;;  %2606 = vmatprep.mubr.msk.bf16.mxu1 %vm2927_vm1, %v2926_v9 }
 0x174   : > { %2597 = vmatpush3.bf16.msra.mxu0 %v2794_v32  ;;  %2605 = vmatpush3.bf16.msra.mxu1 %v2795_v33  ;;  %v2400_v32 = vld [vmem:[%s3517_s5 + $0x2] ss:$0 sm:$0xff]  ;;  %v2401_v33 = vld [vmem:[%s3517_s5 + $0x3] ss:$0 sm:$0xff] }
 0x175   : > { %2610 = vmatprep.subr.bf16.mxu0 %v2926_v9  ;;  %2618 = vmatprep.subr.bf16.mxu1 %v2926_v9 }
 0x177   : > { %2599 = vmatmul.mubr.msk.bf16.vlgmr.msra.gmra.mrb[12].mxu0 %vm628_vm0, %v3126_v23  ;;  %2607 = vmatmul.mubr.msk.bf16.vlgmr.msra.gmra.mrb[12].mxu1 %vm628_vm0, %v3126_v23 }
 0x178   : > { %2611 = vmatpush3.bf16.msra.mxu0 %v2796_v34  ;;  %2619 = vmatpush3.bf16.msra.mxu1 %v2797_v35 }
 0x179   : > { %2612 = vmatprep.subr.bf16.mxu0 %v2926_v9  ;;  %2620 = vmatprep.subr.bf16.mxu1 %v2926_v9 }
 0x17a   : > { %2614 = vmatprep.mubr.msk.bf16.mxu0 %vm2927_vm1, %v2926_v9  ;;  %2622 = vmatprep.mubr.msk.bf16.mxu1 %vm2927_vm1, %v2926_v9 }
 0x17c   : > { %2613 = vmatpush3.bf16.msra.mxu0 %v2798_v36  ;;  %2621 = vmatpush3.bf16.msra.mxu1 %v2799_v37  ;;  %v2430_v36 = vld [vmem:[%s3521_s9] ss:$0 sm:$0xff]  ;;  %v2431_v37 = vld [vmem:[%s3521_s9 + $0x1] ss:$0 sm:$0xff] }
 0x17d   : > { %2626 = vmatprep.subr.bf16.mxu0 %v2926_v9  ;;  %2634 = vmatprep.subr.bf16.mxu1 %v2926_v9 }
 0x17f   : > { %2615 = vmatmul.mubr.msk.bf16.vlgmr.msra.gmra.mrb[16].mxu0 %vm628_vm0, %v3126_v23  ;;  %2623 = vmatmul.mubr.msk.bf16.vlgmr.msra.gmra.mrb[16].mxu1 %vm628_vm0, %v3126_v23 }
 0x180   : > { %2627 = vmatpush3.bf16.msra.mxu0 %v2800_v38  ;;  %2635 = vmatpush3.bf16.msra.mxu1 %v2801_v39 }
 0x181   : > { %2628 = vmatprep.subr.bf16.mxu0 %v2926_v9  ;;  %2636 = vmatprep.subr.bf16.mxu1 %v2926_v9 }
 0x182   : > { %2630 = vmatprep.mubr.msk.bf16.mxu0 %vm2927_vm1, %v2926_v9  ;;  %2638 = vmatprep.mubr.msk.bf16.mxu1 %vm2927_vm1, %v2926_v9 }
 0x184   : > { %2629 = vmatpush3.bf16.msra.mxu0 %v2802_v40  ;;  %2637 = vmatpush3.bf16.msra.mxu1 %v2803_v41 }
 0x185   : > { %2642 = vmatprep.subr.bf16.mxu0 %v2926_v9  ;;  %2648 = vmatprep.subr.bf16.mxu1 %v2926_v9 }
 0x187   : > { %2631 = vmatmul.mubr.msk.bf16.vlgmr.msra.gmra.mrb[20].mxu0 %vm628_vm0, %v3126_v23  ;;  %2639 = vmatmul.mubr.msk.bf16.vlgmr.msra.gmra.mrb[20].mxu1 %vm628_vm0, %v3126_v23 }
 0x188   : > { %2644 = vmatprep.mubr.msk.bf16.mxu0 %vm2927_vm1, %v2926_v9  ;;  %2650 = vmatprep.mubr.msk.bf16.mxu1 %vm2927_vm1, %v2926_v9 }
 0x232   : > { %v751_v42 = vpop.f32.mrb[0].mxu0  ;;  %v803_v43 = vpop.f32.mrb[0].mxu1 }
 0x233   : > { %v2552_v44 = vpop.f32.mrb[1].mxu0  ;;  %v2560_v45 = vpop.f32.mrb[1].mxu1  ;;  %v752_v16 = vadd.f32 %v2398_v10, %v751_v42  ;;  %v804_v17 = vadd.f32 %v2399_v11, %v803_v43 }
 0x234   : > { %v754_v46 = vpop.f32.mrb[2].mxu0  ;;  %v806_v47 = vpop.f32.mrb[2].mxu1 }
 0x235   : > { %v2553_v48 = vpop.f32.mrb[3].mxu0  ;;  %v2561_v49 = vpop.f32.mrb[3].mxu1  ;;  %v1417_v26 = vpack.c.bf16 %v752_v16, %v752_v16  ;;  %v1418_v27 = vpack.c.bf16 %v804_v17, %v804_v17 }
 0x23a   : > { %v855_v50 = vpop.f32.mrb[4].mxu0  ;;  %v907_v51 = vpop.f32.mrb[4].mxu1 }
 0x23b   : > { %v2568_v52 = vpop.f32.mrb[5].mxu0  ;;  %v2576_v53 = vpop.f32.mrb[5].mxu1  ;;  %v856_v38 = vadd.f32 %v2400_v32, %v855_v50  ;;  %v908_v39 = vadd.f32 %v2401_v33, %v907_v51  ;;  %v2432_v32 = vld [vmem:[%s3521_s9 + $0x2] ss:$0 sm:$0xff] }
 0x23c   : > { %v858_v54 = vpop.f32.mrb[6].mxu0  ;;  %v910_v55 = vpop.f32.mrb[6].mxu1 }
 0x23d   : > { %v2569_v56 = vpop.f32.mrb[7].mxu0  ;;  %v2577_v57 = vpop.f32.mrb[7].mxu1  ;;  %v1419_v48 = vpack.c.bf16 %v856_v38, %v856_v38  ;;  %v1420_v49 = vpack.c.bf16 %v908_v39, %v908_v39  ;;  %v2433_v39 = vld [vmem:[%s3521_s9 + $0x3] ss:$0 sm:$0xff] }
 0x242   : > { %v1003_v60 = vpop.f32.mrb[8].mxu0  ;;  %v1055_v61 = vpop.f32.mrb[8].mxu1 }
 0x243   : > { %v1004_v62 = vadd.f32 %v2414_v58, %v1003_v60  ;;  %v1056_v63 = vadd.f32 %v2415_v59, %v1055_v61  ;;  %v2584_v1 = vpop.f32.mrb[9].mxu0  ;;  %v2592_v2 = vpop.f32.mrb[9].mxu1 }
 0x244   : > { %v1006_v3 = vpop.f32.mrb[10].mxu0  ;;  %v1058_v4 = vpop.f32.mrb[10].mxu1  ;;  %v2446_v1 = vld [vmem:[%s622_s25] ss:$0 sm:$0xff]  ;;  %s3358_s25 = scalar_lea.vmem [#allocation4], %s3537_s20  ;;  %s2834_s20 = sshll.u32 %s2928_s22, 4  ;;  %s2835_s20 = int_to_ptr.vmem [resolvable:$false] %s2834_s20 }
 0x245   : > { %v1421_v5 = vpack.c.bf16 %v1004_v62, %v1004_v62  ;;  %v1422_v6 = vpack.c.bf16 %v1056_v63, %v1056_v63  ;;  %v2585_v7 = vpop.f32.mrb[11].mxu0  ;;  %v2593_v8 = vpop.f32.mrb[11].mxu1  ;;  %s2289_s28 = sshll.u32 %s3358_s25, 4  ;;  %s2836_s4 = scalar_lea.vmem %s2835_s20, 256  ;;  %s2290_s28 = int_to_ptr.vmem [resolvable:$true] %s2289_s28 }
 0x246   : > { %s2830_s26 = scalar_lea.vmem %s2290_s28, 128  ;;  %p2837_p0 = scmp.lt.s32.totalorder %s2290_s28, %s2835_s20 }
 0x247   : > { %v1436_v12 = vsel %vm1431_vm2, %v1421_v5, 0  ;;  %v1482_v13 = vsel %vm1431_vm2, %v1422_v6, 0  ;;  %p2831_p11 = scmp.ne.s32.totalorder %s2290_s28, %s2830_s26  ;;  %p2838_p1 = scmp.lt.s32.totalorder %s2836_s4, %s2830_s26 }
 0x248   : > { %2643 = vmatpush3.bf16.xpose.msra.mxu0 %v1436_v12  ;;  %2649 = vmatpush3.bf16.xpose.msra.mxu1 %v1482_v13 }
 0x249   : > { %2654 = vmatprep.subr.bf16.mxu0 %v2926_v9  ;;  %2660 = vmatprep.subr.bf16.mxu1 %v2926_v9  ;;  %p2832_p12 = pnand %p2831_p11, %p3068_p5  ;;  %p2839_p2 = por %p2838_p1, %p2837_p0 }
 0x24a   : > { %v1107_v18 = vpop.f32.mrb[12].mxu0  ;;  %v1159_v19 = vpop.f32.mrb[12].mxu1 }
 0x24b   : > { %v1108_v20 = vadd.f32 %v2416_v14, %v1107_v18  ;;  %v1160_v21 = vadd.f32 %v2417_v15, %v1159_v19  ;;  %v2600_v22 = vpop.f32.mrb[13].mxu0  ;;  %v2608_v23 = vpop.f32.mrb[13].mxu1  ;;  %p2833_p13 = pneg %p2832_p12 }
 0x24c   : > { %v1110_v24 = vpop.f32.mrb[14].mxu0  ;;  %v1162_v25 = vpop.f32.mrb[14].mxu1 }
 0x24d   : > { %v1423_v28 = vpack.c.bf16 %v1108_v20, %v1108_v20  ;;  %v1424_v29 = vpack.c.bf16 %v1160_v21, %v1160_v21  ;;  %v2601_v30 = vpop.f32.mrb[15].mxu0  ;;  %v2609_v31 = vpop.f32.mrb[15].mxu1  ;;  %p2840_p3 = pnand %p2839_p2, %p2833_p13 }
 0x24f   : > { %v1528_v34 = vsel %vm1431_vm2, %v1423_v28, 0  ;;  %v1574_v35 = vsel %vm1431_vm2, %v1424_v29, 0  ;;  %2645 = vmatmul.mubr.msk.bf16.vlgmr.msra.gmra.mrb[24].mxu0 %vm1431_vm2, %v1417_v26  ;;  %2651 = vmatmul.mubr.msk.bf16.vlgmr.msra.gmra.mrb[24].mxu1 %vm1431_vm2, %v1418_v27 }
 0x250   : > { %2655 = vmatpush3.bf16.xpose.msra.mxu0 %v1528_v34  ;;  %2661 = vmatpush3.bf16.xpose.msra.mxu1 %v1574_v35 }
 0x251   : > { %2656 = vmatprep.mubr.msk.bf16.mxu0 %vm2927_vm1, %v2926_v9  ;;  %2662 = vmatprep.mubr.msk.bf16.mxu1 %vm2927_vm1, %v2926_v9 }
 0x252   : > { %v1255_v40 = vpop.f32.mrb[16].mxu0  ;;  %v1307_v41 = vpop.f32.mrb[16].mxu1  ;;  %2666 = vmatprep.subr.bf16.mxu0 %v2926_v9  ;;  %2672 = vmatprep.subr.bf16.mxu1 %v2926_v9 }
 0x253   : > { %v1256_v42 = vadd.f32 %v2430_v36, %v1255_v40  ;;  %v1308_v43 = vadd.f32 %v2431_v37, %v1307_v41  ;;  %v2616_v44 = vpop.f32.mrb[17].mxu0  ;;  %v2624_v45 = vpop.f32.mrb[17].mxu1 }
 0x254   : > { %v1258_v46 = vpop.f32.mrb[18].mxu0  ;;  %v1310_v47 = vpop.f32.mrb[18].mxu1 }
 0x255   : > { %v1660_v50 = vpack.c.bf16 %v1256_v42, %v1256_v42  ;;  %v1661_v51 = vpack.c.bf16 %v1308_v43, %v1308_v43  ;;  %v2617_v52 = vpop.f32.mrb[19].mxu0  ;;  %v2625_v53 = vpop.f32.mrb[19].mxu1 }
 0x257   : > { %v1669_v54 = vsel %vm1667_vm3, %v1660_v50, 0  ;;  %v1715_v55 = vsel %vm1667_vm3, %v1661_v51, 0  ;;  %2657 = vmatmul.mubr.msk.bf16.vlgmr.msra.gmra.mrb[28].mxu0 %vm1431_vm2, %v1419_v48  ;;  %2663 = vmatmul.mubr.msk.bf16.vlgmr.msra.gmra.mrb[28].mxu1 %vm1431_vm2, %v1420_v49 }
 0x258   : > { %2667 = vmatpush3.bf16.msra.mxu0 %v1669_v54  ;;  %2673 = vmatpush3.bf16.msra.mxu1 %v1715_v55 }
 0x259   : > { %2668 = vmatprep.mubr.msk.bf16.mxu0 %vm2927_vm1, %v2926_v9  ;;  %2678 = vmatprep.subr.bf16.mxu0 %v2926_v9 }
 0x25a   : > { %v1359_v56 = vpop.f32.mrb[20].mxu0  ;;  %v1411_v57 = vpop.f32.mrb[20].mxu1  ;;  %2674 = vmatprep.mubr.msk.bf16.mxu1 %vm2927_vm1, %v2926_v9  ;;  %2684 = vmatprep.subr.bf16.mxu1 %v2926_v9 }
 0x25b   : > { %v2632_v58 = vpop.f32.mrb[21].mxu0  ;;  %v2640_v59 = vpop.f32.mrb[21].mxu1  ;;  %v1360_v38 = vadd.f32 %v2432_v32, %v1359_v56  ;;  %v1412_v43 = vadd.f32 %v2433_v39, %v1411_v57 }
 0x25c   : > { %v1362_v60 = vpop.f32.mrb[22].mxu0  ;;  %v1414_v61 = vpop.f32.mrb[22].mxu1  ;;  %v1857_v59 = vld [vmem:[%s3522_s10] sm:$0xf] }
 0x25d   : > { %v2633_v62 = vpop.f32.mrb[23].mxu0  ;;  %v2641_v63 = vpop.f32.mrb[23].mxu1  ;;  %v1662_v42 = vpack.c.bf16 %v1360_v38, %v1360_v38  ;;  %v1663_v48 = vpack.c.bf16 %v1412_v43, %v1412_v43  ;;  %v1865_v60 = vsel %vm1667_vm3, %v1857_v59, 0  ;;  %v1858_v61 = vld [vmem:[%s3522_s10 + $0x4] sm:$0xf] }
 0x25e   : > { %v1911_v62 = vsel %vm1667_vm3, %v1858_v61, 0 }
 0x25f   : > { %v1761_v47 = vsel %vm1667_vm3, %v1662_v42, 0  ;;  %v1807_v52 = vsel %vm1667_vm3, %v1663_v48, 0 }
 0x322   : > { %v1472_v2 = vpop.f32.mrb[24].mxu0  ;;  %v1518_v3 = vpop.f32.mrb[24].mxu1 }
 0x323   : > { %v1473_v4 = vadd.f32 %v2446_v1, %v1472_v2  ;;  %v2646_v5 = vpop.f32.mrb[25].mxu0  ;;  %v2652_v6 = vpop.f32.mrb[25].mxu1  ;;  %v1519_v10 = vadd.f32 %v2446_v1, %v1518_v3 }
 0x324   : > { %v1475_v7 = vpop.f32.mrb[26].mxu0  ;;  %v1521_v8 = vpop.f32.mrb[26].mxu1 }
 0x325   : > { %v2647_v11 = vpop.f32.mrb[27].mxu0  ;;  %v2653_v12 = vpop.f32.mrb[27].mxu1  ;;  %v1616_v13 = vsel %vm1431_vm2, %v1473_v4, -inf  ;;  %v1619_v14 = vsel %vm1431_vm2, %v1519_v10, -inf }
 0x326   : > { %1617 = vmax.xlane.f32.xlu1 %v1616_v13 }
 0x32a   : > { %v1610_v15 = vpop.f32.mrb[28].mxu1  ;;  %1620 = vmax.xlane.f32.xlu1 %v1619_v14  ;;  %v1564_v16 = vpop.f32.mrb[28].mxu0 }
 0x32b   : > { %v1611_v17 = vadd.f32 %v2446_v1, %v1610_v15  ;;  %v1565_v18 = vadd.f32 %v2446_v1, %v1564_v16  ;;  %v2658_v19 = vpop.f32.mrb[29].mxu0  ;;  %v2664_v20 = vpop.f32.mrb[29].mxu1 }
 0x32c   : > { %v1567_v21 = vpop.f32.mrb[30].mxu0  ;;  %v1613_v22 = vpop.f32.mrb[30].mxu1 }
 0x32d   : > { %v2659_v23 = vpop.f32.mrb[31].mxu0  ;;  %v2665_v24 = vpop.f32.mrb[31].mxu1  ;;  %v1625_v25 = vsel %vm1431_vm2, %v1611_v17, -inf  ;;  %v1622_v26 = vsel %vm1431_vm2, %v1565_v18, -inf  ;;  %v1859_v22 = vld [vmem:[%s3522_s10 + $0x8] sm:$0xf] }
 0x32e   : > { %1626 = vmax.xlane.f32.xlu1 %v1625_v25  ;;  %1623 = vmax.xlane.f32.xlu0 %v1622_v26 }
 0x3b3   : > { %v1618_v27 = vpop.xlane.xlu1 %1617 }
 0x3b4   : > { %v1628_v28 = vsub.f32 %v1473_v4, %v1618_v27 }
 0x3b6   : > { %v1632_v29 = vmul.f32 1.442695, %v1628_v28  ;;  %v1957_v28 = vsel %vm1667_vm3, %v1859_v22, 0 }
 0x3b7   : > { %v1621_v30 = vpop.xlane.xlu1 %1620 }
 0x3b8   : > { %2812 = vpow2.f32 %v1632_v29  ;;  %v1629_v31 = vsub.f32 %v1519_v10, %v1621_v30  ;;  %v1860_v30 = vld [vmem:[%s3522_s10 + $0xc] sm:$0xf] }
 0x3ba   : > { %v1634_v33 = vmul.f32 1.442695, %v1629_v31 }
 0x3bb   : > { %v1627_v34 = vpop.xlane.xlu1 %1626  ;;  %v1624_v35 = vpop.xlane.xlu0 %1623 }
 0x3bc   : > { %2814 = vpow2.f32 %v1634_v33  ;;  %v1631_v36 = vsub.f32 %v1611_v17, %v1627_v34  ;;  %v1630_v37 = vsub.f32 %v1565_v18, %v1624_v35 }
 0x3be   : > { %v1638_v40 = vmul.f32 1.442695, %v1631_v36  ;;  %v1636_v41 = vmul.f32 1.442695, %v1630_v37  ;;  %v2003_v36 = vsel %vm1667_vm3, %v1860_v30, 0 }
 0x3c0   : > { %2816 = vpow2.f32 %v1638_v40 }
 0x3c1   : > { %2818 = vpow2.f32 %v1636_v41 }
 0x3c2   : > { %v2813_v44 = vpop.eup %2812 }
 0x3c3   : > { %v1640_v45 = vsel %vm1431_vm2, %v2813_v44, 0.0  ;;  %v1656_v46 = vpack.c.bf16 %v2813_v44, %v2813_v44 }
 0x3c4   : > { %1641 = vadd.xlane.f32.xlu0 %v1640_v45 }
 0x3c5   : > { %2669 = vmatmul.mubr.msk.bf16.vlgmr.msra.gmra.mrb[32].mxu0 %vm1431_vm2, %v1656_v46 }
 0x3c6   : > { %v2815_v49 = vpop.eup %2814  ;;  %2679 = vmatpush3.bf16.msra.mxu0 %v1761_v47  ;;  %2680 = vmatprep.mubr.msk.bf16.mxu0 %vm2927_vm1, %v2926_v9 }
 0x3c7   : > { %v1643_v50 = vsel %vm1431_vm2, %v2815_v49, 0.0  ;;  %v1657_v51 = vpack.c.bf16 %v2815_v49, %v2815_v49  ;;  %2690 = vmatprep.subr.bf16.mxu0 %v2926_v9 }
 0x3c8   : > { %1644 = vadd.xlane.f32.xlu1 %v1643_v50 }
 0x3c9   : > { %2675 = vmatmul.mubr.msk.bf16.vlgmr.msra.gmra.mrb[32].mxu1 %vm1431_vm2, %v1657_v51 }
 0x3ca   : > { %v2817_v53 = vpop.eup %2816  ;;  %2685 = vmatpush3.bf16.msra.mxu1 %v1807_v52  ;;  %2686 = vmatprep.mubr.msk.bf16.mxu1 %vm2927_vm1, %v2926_v9 }
 0x3cb   : > { %v2819_v54 = vpop.eup %2818  ;;  %v1649_v55 = vsel %vm1431_vm2, %v2817_v53, 0.0  ;;  %2696 = vmatprep.subr.bf16.mxu1 %v2926_v9  ;;  %v1659_v58 = vpack.c.bf16 %v2817_v53, %v2817_v53 }
 0x3cc   : > { %1650 = vadd.xlane.f32.xlu1 %v1649_v55  ;;  %v1646_v56 = vsel %vm1431_vm2, %v2819_v54, 0.0  ;;  %v1658_v57 = vpack.c.bf16 %v2819_v54, %v2819_v54 }
 0x3cd   : > { %1647 = vadd.xlane.f32.xlu0 %v1646_v56 }
 0x3ce   : > { %2681 = vmatmul.mubr.msk.bf16.vlgmr.msra.gmra.mrb[36].mxu0 %vm1431_vm2, %v1658_v57 }
 0x3cf   : > { %2692 = vmatprep.mubr.msk.bf16.mxu0 %vm2927_vm1, %v2926_v9  ;;  %2691 = vmatpush3.bf16.msra.mxu0 %v1865_v60 }
 0x3d0   : > { %2702 = vmatprep.subr.bf16.mxu0 %v2926_v9 }
 0x3d1   : > { %2687 = vmatmul.mubr.msk.bf16.vlgmr.msra.gmra.mrb[36].mxu1 %vm1431_vm2, %v1659_v58 }
 0x3d2   : > { %2698 = vmatprep.mubr.msk.bf16.mxu1 %vm2927_vm1, %v2926_v9  ;;  %2697 = vmatpush3.bf16.msra.mxu1 %v1911_v62 }
 0x3d3   : > { %2708 = vmatprep.subr.bf16.mxu1 %v2926_v9 }
 0x451   : > { %v1642_v63 = vpop.xlane.xlu0 %1641 }
 0x452   : > { %2820 = vrcp.f32 %v1642_v63 }
 0x455   : > { %v1645_v1 = vpop.xlane.xlu1 %1644 }
 0x456   : > { %2822 = vrcp.f32 %v1645_v1 }
 0x459   : > { %v1651_v2 = vpop.xlane.xlu1 %1650 }
 0x45a   : > { %2824 = vrcp.f32 %v1651_v2  ;;  %v1648_v3 = vpop.xlane.xlu0 %1647 }
 0x45b   : > { %2826 = vrcp.f32 %v1648_v3 }
 0x45c   : > { %v2821_v4 = vpop.eup %2820 }
 0x45d   : > { %v2244_v7 = vmul.f32 %v2821_v4, %v2813_v44 }
 0x45f   : > { %v2248_v14 = vsel %vm1431_vm2, %v2244_v7, 0.0 }
 0x460   : > { %v2823_v5 = vpop.eup %2822 }
 0x461   : > { %v2245_v6 = vmul.f32 %v2823_v5, %v2815_v49 }
 0x463   : > { %v2249_v10 = vsel %vm1431_vm2, %v2245_v6, 0.0 }
 0x464   : > { %v2825_v8 = vpop.eup %2824  ;;  %v2250_v15 = vadd.f32 %v2249_v10, %v2248_v14 }
 0x465   : > { %v2827_v11 = vpop.eup %2826  ;;  %v2247_v13 = vmul.f32 %v2825_v8, %v2817_v53 }
 0x466   : > { %v2246_v12 = vmul.f32 %v2827_v11, %v2819_v54 }
 0x467   : > { %v2253_v18 = vsel %vm1431_vm2, %v2247_v13, 0.0 }
 0x468   : > { %v2251_v16 = vsel %vm1431_vm2, %v2246_v12, 0.0 }
 0x469   : > { %v2252_v17 = vadd.f32 %v2251_v16, %v2250_v15 }
 0x46b   : > { %v2254_v19 = vadd.f32 %v2253_v18, %v2252_v17 }
 0x46d   : > { %v2255_v20 = vmul.f32 0.25, %v2254_v19  ;;  %v2804_v19 = vld [vmem:[%s3526_s14] sm:$0xff]  }
 0x46f   : > { %2256 = vst.msk [vmem:[%s3358_s25] sm:$0xff] %vm1431_vm2, %v2255_v20  ;;  %v2806_v20 = vld [vmem:[%s3528_s16] sm:$0xff]  }
 0x498   : > { %v1705_v21 = vpop.f32.mrb[32].mxu0 }
 0x499   : > { %v1849_v23 = vmul.f32 %v2821_v4, %v1705_v21  ;;  %v2670_v24 = vpop.f32.mrb[33].mxu0  ;;  %v2807_v21 = vld [vmem:[%s3528_s16 + $0x8] sm:$0xff]  }
 0x49a   : > { %v1708_v25 = vpop.f32.mrb[34].mxu0 }
 0x49b   : > { %v1853_v26 = vpack.c.bf16 %v1849_v23, %v1849_v23  ;;  %v2671_v27 = vpop.f32.mrb[35].mxu0 }
 0x49c   : > { %v1751_v29 = vpop.f32.mrb[32].mxu1 }
 0x49d   : > { %v1850_v31 = vmul.f32 %v2823_v5, %v1751_v29  ;;  %v2676_v32 = vpop.f32.mrb[33].mxu1  ;;  %2693 = vmatmul.mubr.msk.bf16.vlgmr.msra.gmra.mrb[40].mxu0 %vm1431_vm2, %v1853_v26  ;;  %v2459_v5 = vld [vmem:[%s3523_s11] ss:$0 sm:$0xff] }
 0x49e   : > { %v1754_v33 = vpop.f32.mrb[34].mxu1  ;;  %2703 = vmatpush3.bf16.msra.mxu0 %v1957_v28  ;;  %2704 = vmatprep.mubr.msk.bf16.mxu0 %vm2927_vm1, %v2926_v9  ;;  %v2460_v26 = vld [vmem:[%s3524_s12] ss:$0 sm:$0xff]  ;;  %v2808_v32 = vld [vmem:[%s3528_s16 + $0x10] sm:$0xff]  }
 0x49f   : > { %v1854_v34 = vpack.c.bf16 %v1850_v31, %v1850_v31  ;;  %v2677_v35 = vpop.f32.mrb[35].mxu1  ;;  %2714 = vmatprep.subr.bf16.mxu0 %v2926_v9  ;;  %v2461_v28 = vld [vmem:[%s3525_s13] ss:$0 sm:$0xff]  ;;  %v2809_v33 = vld [vmem:[%s3528_s16 + $0x18] sm:$0xff]  }
 0x4a1   : > { %v1797_v37 = vpop.f32.mrb[36].mxu0  ;;  %2699 = vmatmul.mubr.msk.bf16.vlgmr.msra.gmra.mrb[40].mxu1 %vm1431_vm2, %v1854_v34  ;;  %v2462_v34 = vld [vmem:[%s3527_s15] ss:$0 sm:$0xff] }
 0x4a2   : > { %v1851_v38 = vmul.f32 %v2827_v11, %v1797_v37  ;;  %v2682_v39 = vpop.f32.mrb[37].mxu0  ;;  %2709 = vmatpush3.bf16.msra.mxu1 %v2003_v36  ;;  %2710 = vmatprep.mubr.msk.bf16.mxu1 %vm2927_vm1, %v2926_v9 }
 0x4a3   : > { %v1800_v40 = vpop.f32.mrb[38].mxu0  ;;  %2722 = vmatprep.subr.bf16.mxu1 %v2926_v9 }
 0x4a4   : > { %v1855_v41 = vpack.c.bf16 %v1851_v38, %v1851_v38  ;;  %v2683_v42 = vpop.f32.mrb[39].mxu0  ;;  %v1843_v43 = vpop.f32.mrb[36].mxu1 }
 0x4a5   : > { %v1852_v44 = vmul.f32 %v2825_v8, %v1843_v43  ;;  %v2688_v45 = vpop.f32.mrb[37].mxu1 }
 0x4a6   : > { %2705 = vmatmul.mubr.msk.bf16.vlgmr.msra.gmra.mrb[44].mxu0 %vm1431_vm2, %v1855_v41  ;;  %v1846_v46 = vpop.f32.mrb[38].mxu1 }
 0x4a7   : > { %v1856_v47 = vpack.c.bf16 %v1852_v44, %v1852_v44  ;;  %v2689_v48 = vpop.f32.mrb[39].mxu1  ;;  %2718 = vmatprep.mubr.msk.bf16.mxu0 %vm2927_vm1, %v2926_v9  ;;  %2715 = vmatpush3.bf16.msra.mxu0 %v2804_v19 }
 0x4a8   : > { %2716 = vmatprep.subr.bf16.mxu0 %v2926_v9 }
 0x4a9   : > { %2711 = vmatmul.mubr.msk.bf16.vlgmr.msra.gmra.mrb[44].mxu1 %vm1431_vm2, %v1856_v47 }
 0x4aa   : > { %2730 = vmatprep.mubr.msk.bf16.mxu1 %vm2927_vm1, %v2926_v9  ;;  %2723 = vmatpush3.bf16.msra.mxu1 %v2806_v20 }
 0x4ab   : > { %2724 = vmatprep.subr.bf16.mxu1 %v2926_v9 }
 0x4ae   : > { %2725 = vmatpush3.bf16.msra.mxu1 %v2807_v21 }
 0x4af   : > { %2726 = vmatprep.subr.bf16.mxu1 %v2926_v9 }
 0x4b2   : > { %2727 = vmatpush3.bf16.msra.mxu1 %v2808_v32 }
 0x4b3   : > { %2728 = vmatprep.subr.bf16.mxu1 %v2926_v9 }
 0x4b6   : > { %2729 = vmatpush3.bf16.msra.mxu1 %v2809_v33 }
 0x570   : > { %v1901_v49 = vpop.f32.mrb[40].mxu0 }
 0x571   : > { %v2694_v50 = vpop.f32.mrb[41].mxu0  ;;  %v2045_v54 = vsel %vm628_vm0, %v1901_v49, 0.0 }
 0x572   : > { %v1904_v51 = vpop.f32.mrb[42].mxu0 }
 0x573   : > { %v2695_v52 = vpop.f32.mrb[43].mxu0 }
 0x574   : > { %v1947_v53 = vpop.f32.mrb[40].mxu1 }
 0x575   : > { %v2046_v55 = vsel %vm628_vm0, %v1947_v53, 0.0  ;;  %v2700_v56 = vpop.f32.mrb[41].mxu1 }
 0x576   : > { %v2047_v57 = vadd.f32 %v2046_v55, %v2045_v54  ;;  %v1950_v58 = vpop.f32.mrb[42].mxu1 }
 0x577   : > { %v2701_v59 = vpop.f32.mrb[43].mxu1 }
 0x579   : > { %v1993_v60 = vpop.f32.mrb[44].mxu0 }
 0x57a   : > { %v2048_v61 = vsel %vm628_vm0, %v1993_v60, 0.0  ;;  %v2706_v62 = vpop.f32.mrb[45].mxu0 }
 0x57b   : > { %v2049_v63 = vadd.f32 %v2048_v61, %v2047_v57  ;;  %v1996_v1 = vpop.f32.mrb[46].mxu0 }
 0x57c   : > { %v2707_v2 = vpop.f32.mrb[47].mxu0  ;;  %v2039_v3 = vpop.f32.mrb[44].mxu1 }
 0x57d   : > { %v2050_v4 = vsel %vm628_vm0, %v2039_v3, 0.0  ;;  %v2712_v6 = vpop.f32.mrb[45].mxu1 }
 0x57e   : > { %v2051_v7 = vadd.f32 %v2050_v4, %v2049_v63  ;;  %v2042_v8 = vpop.f32.mrb[46].mxu1 }
 0x57f   : > { %v2713_v10 = vpop.f32.mrb[47].mxu1 }
 0x580   : > { %v2059_v11 = vadd.f32 %v2459_v5, %v2051_v7 }
 0x582   : > { %v3392_v12 = vadd.f32 %v2059_v11, %v3086_v0  ;;  %v2805_v0 = vld [vmem:[%s3526_s14 + $0x8] sm:$0xff]  }
 0x583   : > { %2717 = vmatpush3.bf16.msra.mxu0 %v2805_v0 }
 0x584   : > { %v2063_v13 = vsel %vm628_vm0, %v3392_v12, 0.0 }
 0x585   : > { %2064 = vadd.xlane.f32.xlu0 %v2063_v13 }
 0x612   : > { %v2065_v14 = vpop.xlane.xlu0 %2064 }
 0x613   : > { %v2066_v15 = vmul.f32 0.03125, %v2065_v14 }
 0x615   : > { %v2067_v16 = vsub.f32 %v3392_v12, %v2066_v15 }
 0x617   : > { %v2068_v17 = vmul.f32 %v2067_v16, %v2067_v16 }
 0x619   : > { %v2069_v18 = vsel %vm628_vm0, %v2068_v17, 0.0 }
 0x61a   : > { %2070 = vadd.xlane.f32.xlu1 %v2069_v18 }
 0x6a7   : > { %v2071_v22 = vpop.xlane.xlu1 %2070 }
 0x6a8   : > { %v2072_v23 = vmul.f32 0.03125, %v2071_v22 }
 0x6aa   : > { %v2073_v24 = vadd.f32 1e-06, %v2072_v23 }
 0x6ac   : > { %2828 = vrsqrt.f32 %v2073_v24 }
 0x6b6   : > { %v2829_v25 = vpop.eup %2828 }
 0x6b7   : > { %v2075_v27 = vmul.f32 %v2829_v25, %v2067_v16 }
 0x6b9   : > { %v2082_v29 = vmul.f32 %v2460_v26, %v2075_v27 }
 0x6bb   : > { %v2089_v30 = vadd.f32 %v2461_v28, %v2082_v29 }
 0x6bd   : > { %v2090_v31 = vpack.c.bf16 %v2089_v30, %v2089_v30 }
 0x6bf   : > { %2719 = vmatmul.mubr.msk.bf16.vlgmr.msra.gmra.mrb[48].mxu0 %vm628_vm0, %v2090_v31 }
 0x792   : > { %v2151_v35 = vpop.f32.mrb[48].mxu0 }
 0x793   : > { %v2152_v36 = vadd.f32 %v2462_v34, %v2151_v35  ;;  %v2720_v37 = vpop.f32.mrb[49].mxu0 }
 0x794   : > { %v2154_v38 = vpop.f32.mrb[50].mxu0 }
 0x795   : > { %v2157_v39 = vmax.f32 %v2152_v36, 0.0  ;;  %v2721_v40 = vpop.f32.mrb[51].mxu0 }
 0x797   : > { %v2158_v41 = vpack.c.bf16 %v2157_v39, %v2157_v39 }
 0x799   : > { %2731 = vmatmul.mubr.msk.bf16.vlgmr.msra.gmra.mrb[48].mxu1 %vm2198_vm4, %v2158_v41 }
 0x79a   : > { %2843 = shalt.err (!%p2840_p3)
}
 0x79b   : > { %s2844_s25 = scalar_lea.hbm %s3436_s2, 128  ;;  %s2848_s22 = scalar_lea.hbm %s3531_s19, 256 }
 0x79c   : > { %p2845_p4 = scmp.ne.s32.totalorder %s3436_s2, %s2844_s25  ;;  %p2849_p9 = scmp.lt.u32.totalorder %s3436_s2, %s3531_s19 }
 0x79d   : > { %p2850_p10 = scmp.lt.u32.totalorder %s2848_s22, %s2844_s25  ;;  %p2852_p12 = scmp.lt.u32.totalorder %s2844_s25, %s3436_s2 }
 0x79e   : > { %p2846_p7 = pnand %p2845_p4, %p3068_p5 }
 0x79f   : > { %p2851_p11 = por %p2850_p10, %p2849_p9 }
 0x7a0   : > { %p2847_p8 = pneg %p2846_p7 }
 0x7a1   : > { %p2853_p13 = por %p2852_p12, %p2851_p11 }
 0x7a3   : > { %p2854_p0 = pnand %p2853_p13, %p2847_p8 }
 0x7a5   : > { %2857 = shalt.err (!%p2854_p0)
}
 0x7a6   : > { %2735 = dma.vmem_to_hbm [thread:$0]  (%p3068_p5), %s2290_s28, 128, %s3436_s2, %s2263_s0   ;;  %v2466_v9 = vld [vmem:[%s3529_s17] ss:$0 sm:$0xff] }
 0x7a7   : > { %s3556_s27 = sshll.u32 %s3350_s23, 3  ;;  %s3557_s25 = sshll.u32 %s3051_s1, 7 }
 0x7a8   : > { %s608_s24 = scalar_lea.vmem [#allocation2], %s3556_s27  ;;  %s3468_s2 = scalar_lea.hbm %s3530_s18, %s3557_s25 }
 0x7a9   : > { %s2276_s29 = sshll.u32 %s608_s24, 4  ;;  %s2258_s28 = scalar_lea.sflag [#allocation3], %s3350_s23  ;;  %s3470_s29 = int_to_ptr.vmem [resolvable:$true] %s2276_s29 }
 0x7aa   : > { %s2858_s0 = scalar_lea.vmem %s3470_s29, 128  ;;  %s2929_s4 = smov [#allocation2]  }
 0x7ab   : > { %p2859_p1 = scmp.ne.s32.totalorder %s3470_s29, %s2858_s0  ;;  %s2862_s1 = sshll.u32 %s2929_s4, 4  ;;  %s2863_s1 = int_to_ptr.vmem [resolvable:$false] %s2862_s1 }
 0x7ac   : > { %s2864_s26 = scalar_lea.vmem %s2863_s1, 256  ;;  %p2865_p4 = scmp.lt.s32.totalorder %s3470_s29, %s2863_s1 }
 0x7ad   : > { %p2860_p2 = pnand %p2859_p1, %p3068_p5  ;;  %p2866_p7 = scmp.lt.s32.totalorder %s2864_s26, %s2858_s0 }
 0x7af   : > { %p2861_p3 = pneg %p2860_p2  ;;  %p2867_p8 = por %p2866_p7, %p2865_p4 }
 0x7b1   : > { %p2868_p9 = pnand %p2867_p8, %p2861_p3 }
 0x86c   : > { %v2236_v42 = vpop.f32.mrb[48].mxu1 }
 0x86d   : > { %v2237_v43 = vadd.f32 %v2466_v9, %v2236_v42  ;;  %v2732_v44 = vpop.f32.mrb[49].mxu1 }
 0x86e   : > { %v2239_v45 = vpop.f32.mrb[50].mxu1 }
 0x86f   : > { %v2242_v46 = vadd.f32 %v2237_v43, %v3392_v12  ;;  %v2733_v47 = vpop.f32.mrb[51].mxu1 }
 0x871   : > { %2243 = vst.msk [vmem:[%s608_s24] sm:$0xff] %vm628_vm0, %v2242_v46 }
 0x872   : > { %2871 = shalt.err (!%p2868_p9)
}
 0x873   : > { %s2872_s23 = scalar_lea.hbm %s3468_s2, 128  ;;  %s2876_s25 = scalar_lea.hbm %s3530_s18, 256 }
 0x874   : > { %p2873_p10 = scmp.ne.s32.totalorder %s3468_s2, %s2872_s23  ;;  %p2877_p13 = scmp.lt.u32.totalorder %s3468_s2, %s3530_s18 }
 0x875   : > { %p2878_p0 = scmp.lt.u32.totalorder %s2876_s25, %s2872_s23  ;;  %p2880_p2 = scmp.lt.u32.totalorder %s2872_s23, %s3468_s2 }
 0x876   : > { %p2874_p11 = pnand %p2873_p10, %p3068_p5 }
 0x877   : > { %p2879_p1 = por %p2878_p0, %p2877_p13 }
 0x878   : > { %p2875_p12 = pneg %p2874_p11 }
 0x879   : > { %p2881_p3 = por %p2880_p2, %p2879_p1 }
 0x87b   : > { %p2882_p4 = pnand %p2881_p3, %p2875_p12 }
 0x87d   : > { %2885 = shalt.err (!%p2882_p4)
}
 0x87e   : > { %2734 = dma.vmem_to_hbm [thread:$0]  (%p3068_p5), %s3470_s29, 128, %s3468_s2, %s2258_s28  }
 0x87f PF: > { %s3558_s0 = sld [smem:[#allocation8_spill]]  ;;  %p2745_p7 = scmp.ge.s32.totalorder %s2924_s21, 2 }
 0x881   : > { %p2739_p8 = pnand %p2745_p7, %p3072_p6 }
 0x885   : > { %s2301_s1 = sand.u32 1, %s3558_s0  }
 0x886   : > { %s2302_s26 = scalar_lea.sflag [#allocation3], %s2301_s1 }
 0x887   : > { %2903 = dma.done.wait (!%p2739_p8), %s2302_s26, 128  }
 0x888   : > { %2905 = vsyncadd (!%p2739_p8), %s2302_s26, 4294967168  ;;  %s2311_s23 = scalar_lea.sflag [#allocation5], %s2301_s1 }
 0x889   : > { %2907 = dma.done.wait (!%p2739_p8), %s2311_s23, 128  }
 0x88a   : > { %2909 = vsyncadd (!%p2739_p8), %s2311_s23, 4294967168  ;;  %s3560_s21 = sld [smem:[#allocation10_spill]]  ;;  %s3561_s3 = sld [smem:[#allocation9_spill]] }
 0x88b   : > { %s3562_s20 = sld [smem:[#allocation11_spill]]  ;;  %s3563_s0 = smov %s2916_s30 }
 0x890   : > { %p33_p5 = scmp.ge.s32.totalorder %s3560_s21, 4   ;;  %s3564_s30 = smov %s3561_s3 }
 0x892   :  { %35 = sbr.rel (!%p33_p5) target bundleno = 11 (0xb), region = 147 }
 0x899   :  { %2316 = vsyncpa [#allocation3], 1 }
 0x89a   :  { %2318 = vsyncpa [#allocation3 + $0x1], 1 }
 0x89b   :  { %2319 = vsyncpa [#allocation5], 1 }
 0x89c   :  { %2321 = vsyncpa [#allocation5 + $0x1], 1 }

</bundles_post_ra>
